<compile_context>
chip_gen: v6e
topology: v6e:2x2x1
jax: 0.10.0
libtpu: 0.0.40
codegen_flags: <defaults>
</compile_context>

<pallas_src>
import math

import jax
import jax.numpy as jnp
from jax.experimental import pallas as pl
from jax.experimental.pallas import tpu as pltpu

_IN = 5
_HID = 50
_OUT = 5
_N_HID_SQ = 5   # fc2..fc6 are the five (50, 50) layers
_LANE = 128


def _round_up(n, m):
    return ((n + m - 1) // m) * m


def _acasxu_kernel(x_ref, w1_ref, wh_ref, w7_ref, b_ref, o_ref):
    """One batch tile (batch on the lane axis) of the fused 7-layer MLP.

    x_ref : (5, TB)       streamed input tile (cast to compute dtype here)
    w1_ref: (50, 5)       W1^T                 (VMEM-resident)
    wh_ref: (5, 50, 50)   stacked W2^T..W6^T   (VMEM-resident)
    w7_ref: (5, 50)       W7^T                 (VMEM-resident)
    b_ref : (7, 50, 1)    f32 bias columns; row 6 uses the first 5 entries
    o_ref : (5, TB)       f32 output tile (lane-dense stores)
    """
    cdt = w1_ref.dtype  # compute dtype (bf16 by default, f32 optional)

    # Layer 1 (5 -> 50) + ReLU:  h = W1^T @ x
    h = jnp.dot(w1_ref[...], x_ref[...].astype(cdt),
                preferred_element_type=jnp.float32)
    h = jnp.maximum(h + b_ref[0], 0.0)

    # Layers 2..6 (50 -> 50) + ReLU; static unroll over the stacked slab.
    # Follow-up (advanced): block-diagonal 250-in-256 MXU packing of the five
    # hidden layers would further raise MXU utilization on v6e/v7x.
    for k in range(_N_HID_SQ):
        h = jnp.dot(wh_ref[k], h.astype(cdt),
                    preferred_element_type=jnp.float32)
        h = jnp.maximum(h + b_ref[k + 1], 0.0)

    # Layer 7 (50 -> 5), no activation.
    out = jnp.dot(w7_ref[...], h.astype(cdt),
                  preferred_element_type=jnp.float32)
    o_ref[...] = (out + b_ref[6][:_OUT]).astype(o_ref.dtype)


def acasxu_forward(x, params, *, tb=8192, compute_dtype=jnp.bfloat16):
    """Fused ACASXu forward (feature-major / lane-dense layout).

    x      : (B, 5) float array
    params : list of 7 (W, b) pairs; W is (in, out) so that y = x @ W + b
    tb     : batch tile size in lanes per grid step (rounded to mult. of 128)
    compute_dtype : jnp.bfloat16 (fast) or jnp.float32 (verification-grade)
    """
    x = jnp.asarray(x)
    B = x.shape[0]

    # ---- pack parameters into a few VMEM-resident transposed slabs ----
    ws = [jnp.asarray(w) for (w, _) in params]
    w1t = ws[0].T.astype(compute_dtype)                                   # (50, 5)
    wht = jnp.stack([w.T for w in ws[1:6]], axis=0).astype(compute_dtype)  # (5, 50, 50)
    w7t = ws[6].T.astype(compute_dtype)                                   # (5, 50)
    b_slab = jnp.zeros((7, _HID, 1), jnp.float32)                         # bias columns
    for i, (_, b) in enumerate(params):
        bv = jnp.reshape(b, (-1,)).astype(jnp.float32)
        b_slab = b_slab.at[i, : bv.shape[0], 0].set(bv)

    # ---- batch tiling: batch lives on the lane axis -> multiples of 128 ----
    b_pad = _round_up(max(B, 1), 2 * _LANE)          # even number of lane groups
    tb = max(_LANE, _round_up(min(int(tb), b_pad), _LANE))
    if tb >= b_pad:
        tb = b_pad // 2                              # guarantee >= 2 grid steps (v7x: 2 TCs)
    b_pad = _round_up(b_pad, tb)
    grid = (b_pad // tb,)

    # Transposed, lane-padded input; kept in its original dtype (cast in-kernel).
    x_t = jnp.pad(x.T, ((0, 0), (0, b_pad - B)))     # (5, b_pad)

    def run(single_buffer_weights):
        def const_spec(shape):
            n = len(shape)
            if single_buffer_weights:
                return pl.BlockSpec(shape, lambda i: (0,) * n,
                                    pipeline_mode=pl.Buffered(1))
            return pl.BlockSpec(shape, lambda i: (0,) * n)

        return pl.pallas_call(
            _acasxu_kernel,
            out_shape=jax.ShapeDtypeStruct((_OUT, b_pad), jnp.float32),
            grid=grid,
            in_specs=[
                pl.BlockSpec((_IN, tb), lambda i: (0, i)),     # streamed x tile
                const_spec((_HID, _IN)),                       # W1^T  (resident)
                const_spec((_N_HID_SQ, _HID, _HID)),           # W2^T..W6^T
                const_spec((_OUT, _HID)),                      # W7^T
                const_spec((7, _HID, 1)),                      # bias columns
            ],
            out_specs=pl.BlockSpec((_OUT, tb), lambda i: (0, i)),
            compiler_params=pltpu.CompilerParams(
                dimension_semantics=("parallel",)),
        )(x_t, w1t, wht, w7t, b_slab)

    try:
        out_t = run(True)
    except Exception:
        # Fallback if single-buffered (Buffered(1)) parameter specs are
        # rejected by this toolchain; weights are still VMEM-resident.
        out_t = run(False)

    return out_t[:, :B].T                            # back to (B, 5)


def init_params(key):
    """PyTorch nn.Linear default init: uniform(+-1/sqrt(fan_in)); W stored (in, out)."""
    sizes = [(_IN, _HID)] + [(_HID, _HID)] * _N_HID_SQ + [(_HID, _OUT)]
    params = []
    for fan_in, fan_out in sizes:
        key, kw, kb = jax.random.split(key, 3)
        bound = 1.0 / math.sqrt(fan_in)
        w = jax.random.uniform(kw, (fan_in, fan_out), jnp.float32, -bound, bound)
        b = jax.random.uniform(kb, (fan_out,), jnp.float32, -bound, bound)
        params.append((w, b))
    return params


def reference_forward(x, params):
    """Pure-JAX float32 reference matching the PyTorch forward."""
    h = jnp.asarray(x, jnp.float32)
    for i, (w, b) in enumerate(params):
        h = h @ w.astype(jnp.float32) + jnp.reshape(b, (1, -1)).astype(jnp.float32)
        if i < len(params) - 1:
            h = jnp.maximum(h, 0.0)
    return h


if __name__ == "__main__":
    key = jax.random.PRNGKey(0)
    key, kx, kx2 = jax.random.split(key, 3)
    params = init_params(key)

    # Small batch (exercises padded lanes and the guaranteed 2-step grid).
    batch = 8
    x = jax.random.normal(kx, (batch, _IN), dtype=jnp.float32)
    out = jax.block_until_ready(acasxu_forward(x, params))
    ref = reference_forward(x, params)
    assert out.shape == (batch, _OUT)
    assert jnp.allclose(out, ref, atol=3e-2, rtol=3e-2), "mismatch vs reference (small)"

    # Multi-tile batch to exercise the pipelined grid path.
    batch2 = 520
    x2 = jax.random.normal(kx2, (batch2, _IN), dtype=jnp.float32)
    out2 = jax.block_until_ready(acasxu_forward(x2, params, tb=256))
    ref2 = reference_forward(x2, params)
    assert out2.shape == (batch2, _OUT)
    assert jnp.allclose(out2, ref2, atol=3e-2, rtol=3e-2), "mismatch vs reference (tiled)"

    # Full-precision compute path (closer to bit-faithful f32 ACAS-Xu).
    out3 = jax.block_until_ready(
        acasxu_forward(x2, params, compute_dtype=jnp.float32))
    assert jnp.allclose(out3, ref2, atol=1e-2, rtol=1e-2), "mismatch vs reference (f32 path)"

    print("KERNEL_OK")
</pallas_src>

<mosaic_0001>
module attributes {stable_mosaic.version = 11 : i64} {
  func.func @_acasxu_kernel(%arg0: i32, %arg1: memref<5x128xf32, #tpu.memory_space<vmem>>, %arg2: memref<50x5xbf16, #tpu.memory_space<vmem>>, %arg3: memref<5x50x50xbf16, #tpu.memory_space<vmem>>, %arg4: memref<5x50xbf16, #tpu.memory_space<vmem>>, %arg5: memref<7x50x1xf32, #tpu.memory_space<vmem>>, %arg6: memref<5x128xf32, #tpu.memory_space<vmem>>) attributes {dimension_semantics = [#tpu.dimension_semantics<parallel>], iteration_bounds = array<i64: 2>, scalar_prefetch = 0 : i64, scratch_operands = 0 : i64, tpu.core_type = #tpu.core_type<tc>, window_params = [{transform_indices = @transform_0, window_bounds = array<i64: 5, 128>}, {pipeline_mode = #tpu.pipeline_mode<synchronous>, transform_indices = @transform_1, window_bounds = array<i64: 50, 5>}, {pipeline_mode = #tpu.pipeline_mode<synchronous>, transform_indices = @transform_2, window_bounds = array<i64: 5, 50, 50>}, {pipeline_mode = #tpu.pipeline_mode<synchronous>, transform_indices = @transform_3, window_bounds = array<i64: 5, 50>}, {pipeline_mode = #tpu.pipeline_mode<synchronous>, transform_indices = @transform_4, window_bounds = array<i64: 7, 50, 1>}, {transform_indices = @transform_5, window_bounds = array<i64: 5, 128>}]} {
    %c0 = arith.constant 0 : index
    %c0_0 = arith.constant 0 : index
    %0 = vector.load %arg2[%c0, %c0_0] : memref<50x5xbf16, #tpu.memory_space<vmem>>, vector<50x5xbf16>
    %c0_1 = arith.constant 0 : index
    %c0_2 = arith.constant 0 : index
    %1 = vector.load %arg1[%c0_1, %c0_2] : memref<5x128xf32, #tpu.memory_space<vmem>>, vector<5x128xf32>
    %2 = arith.truncf %1 : vector<5x128xf32> to vector<5x128xbf16>
    %cst = arith.constant dense<0.000000e+00> : vector<50x128xf32>
    %3 = tpu.matmul %0, %2, %cst {dimension_numbers = #tpu.dot_dimension_numbers<[1], [0], [0], [1], [0, 0, 1, 1], [], []>} : vector<50x5xbf16>, vector<5x128xbf16>, vector<50x128xf32> -> vector<50x128xf32>
    %c0_3 = arith.constant 0 : index
    %c0_4 = arith.constant 0 : index
    %c0_5 = arith.constant 0 : index
    %4 = vector.load %arg5[%c0_3, %c0_4, %c0_5] : memref<7x50x1xf32, #tpu.memory_space<vmem>>, vector<1x50x1xf32>
    %5 = vector.shape_cast %4 : vector<1x50x1xf32> to vector<50x1xf32>
    %6 = vector.broadcast %5 : vector<50x1xf32> to vector<50x128xf32>
    %7 = arith.addf %3, %6 : vector<50x128xf32>
    %cst_6 = arith.constant 0.000000e+00 : f32
    %8 = vector.broadcast %cst_6 : f32 to vector<50x128xf32>
    %9 = arith.maximumf %7, %8 : vector<50x128xf32>
    %c0_7 = arith.constant 0 : index
    %c0_8 = arith.constant 0 : index
    %c0_9 = arith.constant 0 : index
    %10 = vector.load %arg3[%c0_7, %c0_8, %c0_9] : memref<5x50x50xbf16, #tpu.memory_space<vmem>>, vector<1x50x50xbf16>
    %11 = vector.shape_cast %10 : vector<1x50x50xbf16> to vector<50x50xbf16>
    %12 = arith.truncf %9 : vector<50x128xf32> to vector<50x128xbf16>
    %cst_10 = arith.constant dense<0.000000e+00> : vector<50x128xf32>
    %13 = tpu.matmul %11, %12, %cst_10 {dimension_numbers = #tpu.dot_dimension_numbers<[1], [0], [0], [1], [0, 0, 1, 1], [], []>} : vector<50x50xbf16>, vector<50x128xbf16>, vector<50x128xf32> -> vector<50x128xf32>
    %c1 = arith.constant 1 : index
    %c0_11 = arith.constant 0 : index
    %c0_12 = arith.constant 0 : index
    %14 = vector.load %arg5[%c1, %c0_11, %c0_12] : memref<7x50x1xf32, #tpu.memory_space<vmem>>, vector<1x50x1xf32>
    %15 = vector.shape_cast %14 : vector<1x50x1xf32> to vector<50x1xf32>
    %16 = vector.broadcast %15 : vector<50x1xf32> to vector<50x128xf32>
    %17 = arith.addf %13, %16 : vector<50x128xf32>
    %cst_13 = arith.constant 0.000000e+00 : f32
    %18 = vector.broadcast %cst_13 : f32 to vector<50x128xf32>
    %19 = arith.maximumf %17, %18 : vector<50x128xf32>
    %c1_14 = arith.constant 1 : index
    %c0_15 = arith.constant 0 : index
    %c0_16 = arith.constant 0 : index
    %20 = vector.load %arg3[%c1_14, %c0_15, %c0_16] : memref<5x50x50xbf16, #tpu.memory_space<vmem>>, vector<1x50x50xbf16>
    %21 = vector.shape_cast %20 : vector<1x50x50xbf16> to vector<50x50xbf16>
    %22 = arith.truncf %19 : vector<50x128xf32> to vector<50x128xbf16>
    %cst_17 = arith.constant dense<0.000000e+00> : vector<50x128xf32>
    %23 = tpu.matmul %21, %22, %cst_17 {dimension_numbers = #tpu.dot_dimension_numbers<[1], [0], [0], [1], [0, 0, 1, 1], [], []>} : vector<50x50xbf16>, vector<50x128xbf16>, vector<50x128xf32> -> vector<50x128xf32>
    %c2 = arith.constant 2 : index
    %c0_18 = arith.constant 0 : index
    %c0_19 = arith.constant 0 : index
    %24 = vector.load %arg5[%c2, %c0_18, %c0_19] : memref<7x50x1xf32, #tpu.memory_space<vmem>>, vector<1x50x1xf32>
    %25 = vector.shape_cast %24 : vector<1x50x1xf32> to vector<50x1xf32>
    %26 = vector.broadcast %25 : vector<50x1xf32> to vector<50x128xf32>
    %27 = arith.addf %23, %26 : vector<50x128xf32>
    %cst_20 = arith.constant 0.000000e+00 : f32
    %28 = vector.broadcast %cst_20 : f32 to vector<50x128xf32>
    %29 = arith.maximumf %27, %28 : vector<50x128xf32>
    %c2_21 = arith.constant 2 : index
    %c0_22 = arith.constant 0 : index
    %c0_23 = arith.constant 0 : index
    %30 = vector.load %arg3[%c2_21, %c0_22, %c0_23] : memref<5x50x50xbf16, #tpu.memory_space<vmem>>, vector<1x50x50xbf16>
    %31 = vector.shape_cast %30 : vector<1x50x50xbf16> to vector<50x50xbf16>
    %32 = arith.truncf %29 : vector<50x128xf32> to vector<50x128xbf16>
    %cst_24 = arith.constant dense<0.000000e+00> : vector<50x128xf32>
    %33 = tpu.matmul %31, %32, %cst_24 {dimension_numbers = #tpu.dot_dimension_numbers<[1], [0], [0], [1], [0, 0, 1, 1], [], []>} : vector<50x50xbf16>, vector<50x128xbf16>, vector<50x128xf32> -> vector<50x128xf32>
    %c3 = arith.constant 3 : index
    %c0_25 = arith.constant 0 : index
    %c0_26 = arith.constant 0 : index
    %34 = vector.load %arg5[%c3, %c0_25, %c0_26] : memref<7x50x1xf32, #tpu.memory_space<vmem>>, vector<1x50x1xf32>
    %35 = vector.shape_cast %34 : vector<1x50x1xf32> to vector<50x1xf32>
    %36 = vector.broadcast %35 : vector<50x1xf32> to vector<50x128xf32>
    %37 = arith.addf %33, %36 : vector<50x128xf32>
    %cst_27 = arith.constant 0.000000e+00 : f32
    %38 = vector.broadcast %cst_27 : f32 to vector<50x128xf32>
    %39 = arith.maximumf %37, %38 : vector<50x128xf32>
    %c3_28 = arith.constant 3 : index
    %c0_29 = arith.constant 0 : index
    %c0_30 = arith.constant 0 : index
    %40 = vector.load %arg3[%c3_28, %c0_29, %c0_30] : memref<5x50x50xbf16, #tpu.memory_space<vmem>>, vector<1x50x50xbf16>
    %41 = vector.shape_cast %40 : vector<1x50x50xbf16> to vector<50x50xbf16>
    %42 = arith.truncf %39 : vector<50x128xf32> to vector<50x128xbf16>
    %cst_31 = arith.constant dense<0.000000e+00> : vector<50x128xf32>
    %43 = tpu.matmul %41, %42, %cst_31 {dimension_numbers = #tpu.dot_dimension_numbers<[1], [0], [0], [1], [0, 0, 1, 1], [], []>} : vector<50x50xbf16>, vector<50x128xbf16>, vector<50x128xf32> -> vector<50x128xf32>
    %c4 = arith.constant 4 : index
    %c0_32 = arith.constant 0 : index
    %c0_33 = arith.constant 0 : index
    %44 = vector.load %arg5[%c4, %c0_32, %c0_33] : memref<7x50x1xf32, #tpu.memory_space<vmem>>, vector<1x50x1xf32>
    %45 = vector.shape_cast %44 : vector<1x50x1xf32> to vector<50x1xf32>
    %46 = vector.broadcast %45 : vector<50x1xf32> to vector<50x128xf32>
    %47 = arith.addf %43, %46 : vector<50x128xf32>
    %cst_34 = arith.constant 0.000000e+00 : f32
    %48 = vector.broadcast %cst_34 : f32 to vector<50x128xf32>
    %49 = arith.maximumf %47, %48 : vector<50x128xf32>
    %c4_35 = arith.constant 4 : index
    %c0_36 = arith.constant 0 : index
    %c0_37 = arith.constant 0 : index
    %50 = vector.load %arg3[%c4_35, %c0_36, %c0_37] : memref<5x50x50xbf16, #tpu.memory_space<vmem>>, vector<1x50x50xbf16>
    %51 = vector.shape_cast %50 : vector<1x50x50xbf16> to vector<50x50xbf16>
    %52 = arith.truncf %49 : vector<50x128xf32> to vector<50x128xbf16>
    %cst_38 = arith.constant dense<0.000000e+00> : vector<50x128xf32>
    %53 = tpu.matmul %51, %52, %cst_38 {dimension_numbers = #tpu.dot_dimension_numbers<[1], [0], [0], [1], [0, 0, 1, 1], [], []>} : vector<50x50xbf16>, vector<50x128xbf16>, vector<50x128xf32> -> vector<50x128xf32>
    %c5 = arith.constant 5 : index
    %c0_39 = arith.constant 0 : index
    %c0_40 = arith.constant 0 : index
    %54 = vector.load %arg5[%c5, %c0_39, %c0_40] : memref<7x50x1xf32, #tpu.memory_space<vmem>>, vector<1x50x1xf32>
    %55 = vector.shape_cast %54 : vector<1x50x1xf32> to vector<50x1xf32>
    %56 = vector.broadcast %55 : vector<50x1xf32> to vector<50x128xf32>
    %57 = arith.addf %53, %56 : vector<50x128xf32>
    %cst_41 = arith.constant 0.000000e+00 : f32
    %58 = vector.broadcast %cst_41 : f32 to vector<50x128xf32>
    %59 = arith.maximumf %57, %58 : vector<50x128xf32>
    %c0_42 = arith.constant 0 : index
    %c0_43 = arith.constant 0 : index
    %60 = vector.load %arg4[%c0_42, %c0_43] : memref<5x50xbf16, #tpu.memory_space<vmem>>, vector<5x50xbf16>
    %61 = arith.truncf %59 : vector<50x128xf32> to vector<50x128xbf16>
    %cst_44 = arith.constant dense<0.000000e+00> : vector<5x128xf32>
    %62 = tpu.matmul %60, %61, %cst_44 {dimension_numbers = #tpu.dot_dimension_numbers<[1], [0], [0], [1], [0, 0, 1, 1], [], []>} : vector<5x50xbf16>, vector<50x128xbf16>, vector<5x128xf32> -> vector<5x128xf32>
    %c6 = arith.constant 6 : index
    %c0_45 = arith.constant 0 : index
    %c0_46 = arith.constant 0 : index
    %63 = vector.load %arg5[%c6, %c0_45, %c0_46] : memref<7x50x1xf32, #tpu.memory_space<vmem>>, vector<1x50x1xf32>
    %64 = vector.shape_cast %63 : vector<1x50x1xf32> to vector<50x1xf32>
    %65 = vector.extract_strided_slice %64 {offsets = [0, 0], sizes = [5, 1], strides = [1, 1]} : vector<50x1xf32> to vector<5x1xf32>
    %66 = vector.broadcast %65 : vector<5x1xf32> to vector<5x128xf32>
    %67 = arith.addf %62, %66 : vector<5x128xf32>
    %c0_47 = arith.constant 0 : index
    %c0_48 = arith.constant 0 : index
    %68 = vector.load %arg6[%c0_47, %c0_48] : memref<5x128xf32, #tpu.memory_space<vmem>>, vector<5x128xf32>
    tpu.vector_store %arg6[%c0_47, %c0_48], %67 {strides = array<i32>} : memref<5x128xf32, #tpu.memory_space<vmem>>, vector<5x128xf32>,
    return
  }
  func.func @transform_0(%arg0: i32) -> (i32, i32) {
    %c0_i32 = arith.constant 0 : i32
    %c0_i32_0 = arith.constant 0 : i32
    return %c0_i32, %arg0 : i32, i32
  }
  func.func @transform_1(%arg0: i32) -> (i32, i32) {
    %c0_i32 = arith.constant 0 : i32
    %c0_i32_0 = arith.constant 0 : i32
    %c0_i32_1 = arith.constant 0 : i32
    return %c0_i32, %c0_i32_0 : i32, i32
  }
  func.func @transform_2(%arg0: i32) -> (i32, i32, i32) {
    %c0_i32 = arith.constant 0 : i32
    %c0_i32_0 = arith.constant 0 : i32
    %c0_i32_1 = arith.constant 0 : i32
    %c0_i32_2 = arith.constant 0 : i32
    return %c0_i32, %c0_i32_0, %c0_i32_1 : i32, i32, i32
  }
  func.func @transform_3(%arg0: i32) -> (i32, i32) {
    %c0_i32 = arith.constant 0 : i32
    %c0_i32_0 = arith.constant 0 : i32
    %c0_i32_1 = arith.constant 0 : i32
    return %c0_i32, %c0_i32_0 : i32, i32
  }
  func.func @transform_4(%arg0: i32) -> (i32, i32, i32) {
    %c0_i32 = arith.constant 0 : i32
    %c0_i32_0 = arith.constant 0 : i32
    %c0_i32_1 = arith.constant 0 : i32
    %c0_i32_2 = arith.constant 0 : i32
    return %c0_i32, %c0_i32_0, %c0_i32_1 : i32, i32, i32
  }
  func.func @transform_5(%arg0: i32) -> (i32, i32) {
    %c0_i32 = arith.constant 0 : i32
    %c0_i32_0 = arith.constant 0 : i32
    return %c0_i32, %arg0 : i32, i32
  }
}

module attributes {stable_mosaic.version = 11 : i64} {
  func.func @_acasxu_kernel(%arg0: i32, %arg1: memref<5x128xf32, #tpu.memory_space<vmem>>, %arg2: memref<50x5xbf16, #tpu.memory_space<vmem>>, %arg3: memref<5x50x50xbf16, #tpu.memory_space<vmem>>, %arg4: memref<5x50xbf16, #tpu.memory_space<vmem>>, %arg5: memref<7x50x1xf32, #tpu.memory_space<vmem>>, %arg6: memref<5x128xf32, #tpu.memory_space<vmem>>) attributes {dimension_semantics = [#tpu.dimension_semantics<parallel>], iteration_bounds = array<i64: 2>, scalar_prefetch = 0 : i64, scratch_operands = 0 : i64, tpu.core_type = #tpu.core_type<tc>, window_params = [{transform_indices = @transform_0, window_bounds = array<i64: 5, 128>}, {pipeline_mode = #tpu.pipeline_mode<synchronous>, transform_indices = @transform_1, window_bounds = array<i64: 50, 5>}, {pipeline_mode = #tpu.pipeline_mode<synchronous>, transform_indices = @transform_2, window_bounds = array<i64: 5, 50, 50>}, {pipeline_mode = #tpu.pipeline_mode<synchronous>, transform_indices = @transform_3, window_bounds = array<i64: 5, 50>}, {pipeline_mode = #tpu.pipeline_mode<synchronous>, transform_indices = @transform_4, window_bounds = array<i64: 7, 50, 1>}, {transform_indices = @transform_5, window_bounds = array<i64: 5, 128>}]} {
    %c0 = arith.constant 0 : index
    %c0_0 = arith.constant 0 : index
    %0 = vector.load %arg2[%c0, %c0_0] : memref<50x5xbf16, #tpu.memory_space<vmem>>, vector<50x5xbf16>
    %c0_1 = arith.constant 0 : index
    %c0_2 = arith.constant 0 : index
    %1 = vector.load %arg1[%c0_1, %c0_2] : memref<5x128xf32, #tpu.memory_space<vmem>>, vector<5x128xf32>
    %2 = arith.truncf %1 : vector<5x128xf32> to vector<5x128xbf16>
    %cst = arith.constant dense<0.000000e+00> : vector<50x128xf32>
    %3 = tpu.matmul %0, %2, %cst {dimension_numbers = #tpu.dot_dimension_numbers<[1], [0], [0], [1], [0, 0, 1, 1], [], []>} : vector<50x5xbf16>, vector<5x128xbf16>, vector<50x128xf32> -> vector<50x128xf32>
    %c0_3 = arith.constant 0 : index
    %c0_4 = arith.constant 0 : index
    %c0_5 = arith.constant 0 : index
    %4 = vector.load %arg5[%c0_3, %c0_4, %c0_5] : memref<7x50x1xf32, #tpu.memory_space<vmem>>, vector<1x50x1xf32>
    %5 = vector.shape_cast %4 : vector<1x50x1xf32> to vector<50x1xf32>
    %6 = vector.broadcast %5 : vector<50x1xf32> to vector<50x128xf32>
    %7 = arith.addf %3, %6 : vector<50x128xf32>
    %cst_6 = arith.constant 0.000000e+00 : f32
    %8 = vector.broadcast %cst_6 : f32 to vector<50x128xf32>
    %9 = arith.maximumf %7, %8 : vector<50x128xf32>
    %c0_7 = arith.constant 0 : index
    %c0_8 = arith.constant 0 : index
    %c0_9 = arith.constant 0 : index
    %10 = vector.load %arg3[%c0_7, %c0_8, %c0_9] : memref<5x50x50xbf16, #tpu.memory_space<vmem>>, vector<1x50x50xbf16>
    %11 = vector.shape_cast %10 : vector<1x50x50xbf16> to vector<50x50xbf16>
    %12 = arith.truncf %9 : vector<50x128xf32> to vector<50x128xbf16>
    %cst_10 = arith.constant dense<0.000000e+00> : vector<50x128xf32>
    %13 = tpu.matmul %11, %12, %cst_10 {dimension_numbers = #tpu.dot_dimension_numbers<[1], [0], [0], [1], [0, 0, 1, 1], [], []>} : vector<50x50xbf16>, vector<50x128xbf16>, vector<50x128xf32> -> vector<50x128xf32>
    %c1 = arith.constant 1 : index
    %c0_11 = arith.constant 0 : index
    %c0_12 = arith.constant 0 : index
    %14 = vector.load %arg5[%c1, %c0_11, %c0_12] : memref<7x50x1xf32, #tpu.memory_space<vmem>>, vector<1x50x1xf32>
    %15 = vector.shape_cast %14 : vector<1x50x1xf32> to vector<50x1xf32>
    %16 = vector.broadcast %15 : vector<50x1xf32> to vector<50x128xf32>
    %17 = arith.addf %13, %16 : vector<50x128xf32>
    %cst_13 = arith.constant 0.000000e+00 : f32
    %18 = vector.broadcast %cst_13 : f32 to vector<50x128xf32>
    %19 = arith.maximumf %17, %18 : vector<50x128xf32>
    %c1_14 = arith.constant 1 : index
    %c0_15 = arith.constant 0 : index
    %c0_16 = arith.constant 0 : index
    %20 = vector.load %arg3[%c1_14, %c0_15, %c0_16] : memref<5x50x50xbf16, #tpu.memory_space<vmem>>, vector<1x50x50xbf16>
    %21 = vector.shape_cast %20 : vector<1x50x50xbf16> to vector<50x50xbf16>
    %22 = arith.truncf %19 : vector<50x128xf32> to vector<50x128xbf16>
    %cst_17 = arith.constant dense<0.000000e+00> : vector<50x128xf32>
    %23 = tpu.matmul %21, %22, %cst_17 {dimension_numbers = #tpu.dot_dimension_numbers<[1], [0], [0], [1], [0, 0, 1, 1], [], []>} : vector<50x50xbf16>, vector<50x128xbf16>, vector<50x128xf32> -> vector<50x128xf32>
    %c2 = arith.constant 2 : index
    %c0_18 = arith.constant 0 : index
    %c0_19 = arith.constant 0 : index
    %24 = vector.load %arg5[%c2, %c0_18, %c0_19] : memref<7x50x1xf32, #tpu.memory_space<vmem>>, vector<1x50x1xf32>
    %25 = vector.shape_cast %24 : vector<1x50x1xf32> to vector<50x1xf32>
    %26 = vector.broadcast %25 : vector<50x1xf32> to vector<50x128xf32>
    %27 = arith.addf %23, %26 : vector<50x128xf32>
    %cst_20 = arith.constant 0.000000e+00 : f32
    %28 = vector.broadcast %cst_20 : f32 to vector<50x128xf32>
    %29 = arith.maximumf %27, %28 : vector<50x128xf32>
    %c2_21 = arith.constant 2 : index
    %c0_22 = arith.constant 0 : index
    %c0_23 = arith.constant 0 : index
    %30 = vector.load %arg3[%c2_21, %c0_22, %c0_23] : memref<5x50x50xbf16, #tpu.memory_space<vmem>>, vector<1x50x50xbf16>
    %31 = vector.shape_cast %30 : vector<1x50x50xbf16> to vector<50x50xbf16>
    %32 = arith.truncf %29 : vector<50x128xf32> to vector<50x128xbf16>
    %cst_24 = arith.constant dense<0.000000e+00> : vector<50x128xf32>
    %33 = tpu.matmul %31, %32, %cst_24 {dimension_numbers = #tpu.dot_dimension_numbers<[1], [0], [0], [1], [0, 0, 1, 1], [], []>} : vector<50x50xbf16>, vector<50x128xbf16>, vector<50x128xf32> -> vector<50x128xf32>
    %c3 = arith.constant 3 : index
    %c0_25 = arith.constant 0 : index
    %c0_26 = arith.constant 0 : index
    %34 = vector.load %arg5[%c3, %c0_25, %c0_26] : memref<7x50x1xf32, #tpu.memory_space<vmem>>, vector<1x50x1xf32>
    %35 = vector.shape_cast %34 : vector<1x50x1xf32> to vector<50x1xf32>
    %36 = vector.broadcast %35 : vector<50x1xf32> to vector<50x128xf32>
    %37 = arith.addf %33, %36 : vector<50x128xf32>
    %cst_27 = arith.constant 0.000000e+00 : f32
    %38 = vector.broadcast %cst_27 : f32 to vector<50x128xf32>
    %39 = arith.maximumf %37, %38 : vector<50x128xf32>
    %c3_28 = arith.constant 3 : index
    %c0_29 = arith.constant 0 : index
    %c0_30 = arith.constant 0 : index
    %40 = vector.load %arg3[%c3_28, %c0_29, %c0_30] : memref<5x50x50xbf16, #tpu.memory_space<vmem>>, vector<1x50x50xbf16>
    %41 = vector.shape_cast %40 : vector<1x50x50xbf16> to vector<50x50xbf16>
    %42 = arith.truncf %39 : vector<50x128xf32> to vector<50x128xbf16>
    %cst_31 = arith.constant dense<0.000000e+00> : vector<50x128xf32>
    %43 = tpu.matmul %41, %42, %cst_31 {dimension_numbers = #tpu.dot_dimension_numbers<[1], [0], [0], [1], [0, 0, 1, 1], [], []>} : vector<50x50xbf16>, vector<50x128xbf16>, vector<50x128xf32> -> vector<50x128xf32>
    %c4 = arith.constant 4 : index
    %c0_32 = arith.constant 0 : index
    %c0_33 = arith.constant 0 : index
    %44 = vector.load %arg5[%c4, %c0_32, %c0_33] : memref<7x50x1xf32, #tpu.memory_space<vmem>>, vector<1x50x1xf32>
    %45 = vector.shape_cast %44 : vector<1x50x1xf32> to vector<50x1xf32>
    %46 = vector.broadcast %45 : vector<50x1xf32> to vector<50x128xf32>
    %47 = arith.addf %43, %46 : vector<50x128xf32>
    %cst_34 = arith.constant 0.000000e+00 : f32
    %48 = vector.broadcast %cst_34 : f32 to vector<50x128xf32>
    %49 = arith.maximumf %47, %48 : vector<50x128xf32>
    %c4_35 = arith.constant 4 : index
    %c0_36 = arith.constant 0 : index
    %c0_37 = arith.constant 0 : index
    %50 = vector.load %arg3[%c4_35, %c0_36, %c0_37] : memref<5x50x50xbf16, #tpu.memory_space<vmem>>, vector<1x50x50xbf16>
    %51 = vector.shape_cast %50 : vector<1x50x50xbf16> to vector<50x50xbf16>
    %52 = arith.truncf %49 : vector<50x128xf32> to vector<50x128xbf16>
    %cst_38 = arith.constant dense<0.000000e+00> : vector<50x128xf32>
    %53 = tpu.matmul %51, %52, %cst_38 {dimension_numbers = #tpu.dot_dimension_numbers<[1], [0], [0], [1], [0, 0, 1, 1], [], []>} : vector<50x50xbf16>, vector<50x128xbf16>, vector<50x128xf32> -> vector<50x128xf32>
    %c5 = arith.constant 5 : index
    %c0_39 = arith.constant 0 : index
    %c0_40 = arith.constant 0 : index
    %54 = vector.load %arg5[%c5, %c0_39, %c0_40] : memref<7x50x1xf32, #tpu.memory_space<vmem>>, vector<1x50x1xf32>
    %55 = vector.shape_cast %54 : vector<1x50x1xf32> to vector<50x1xf32>
    %56 = vector.broadcast %55 : vector<50x1xf32> to vector<50x128xf32>
    %57 = arith.addf %53, %56 : vector<50x128xf32>
    %cst_41 = arith.constant 0.000000e+00 : f32
    %58 = vector.broadcast %cst_41 : f32 to vector<50x128xf32>
    %59 = arith.maximumf %57, %58 : vector<50x128xf32>
    %c0_42 = arith.constant 0 : index
    %c0_43 = arith.constant 0 : index
    %60 = vector.load %arg4[%c0_42, %c0_43] : memref<5x50xbf16, #tpu.memory_space<vmem>>, vector<5x50xbf16>
    %61 = arith.truncf %59 : vector<50x128xf32> to vector<50x128xbf16>
    %cst_44 = arith.constant dense<0.000000e+00> : vector<5x128xf32>
    %62 = tpu.matmul %60, %61, %cst_44 {dimension_numbers = #tpu.dot_dimension_numbers<[1], [0], [0], [1], [0, 0, 1, 1], [], []>} : vector<5x50xbf16>, vector<50x128xbf16>, vector<5x128xf32> -> vector<5x128xf32>
    %c6 = arith.constant 6 : index
    %c0_45 = arith.constant 0 : index
    %c0_46 = arith.constant 0 : index
    %63 = vector.load %arg5[%c6, %c0_45, %c0_46] : memref<7x50x1xf32, #tpu.memory_space<vmem>>, vector<1x50x1xf32>
    %64 = vector.shape_cast %63 : vector<1x50x1xf32> to vector<50x1xf32>
    %65 = vector.extract_strided_slice %64 {offsets = [0, 0], sizes = [5, 1], strides = [1, 1]} : vector<50x1xf32> to vector<5x1xf32>
    %66 = vector.broadcast %65 : vector<5x1xf32> to vector<5x128xf32>
    %67 = arith.addf %62, %66 : vector<5x128xf32>
    %c0_47 = arith.constant 0 : index
    %c0_48 = arith.constant 0 : index
    %68 = vector.load %arg6[%c0_47, %c0_48] : memref<5x128xf32, #tpu.memory_space<vmem>>, vector<5x128xf32>
    tpu.vector_store %arg6[%c0_47, %c0_48], %67 {strides = array<i32>} : memref<5x128xf32, #tpu.memory_space<vmem>>, vector<5x128xf32>,
    return
  }
  func.func @transform_0(%arg0: i32) -> (i32, i32) {
    %c0_i32 = arith.constant 0 : i32
    %c0_i32_0 = arith.constant 0 : i32
    return %c0_i32, %arg0 : i32, i32
  }
  func.func @transform_1(%arg0: i32) -> (i32, i32) {
    %c0_i32 = arith.constant 0 : i32
    %c0_i32_0 = arith.constant 0 : i32
    %c0_i32_1 = arith.constant 0 : i32
    return %c0_i32, %c0_i32_0 : i32, i32
  }
  func.func @transform_2(%arg0: i32) -> (i32, i32, i32) {
    %c0_i32 = arith.constant 0 : i32
    %c0_i32_0 = arith.constant 0 : i32
    %c0_i32_1 = arith.constant 0 : i32
    %c0_i32_2 = arith.constant 0 : i32
    return %c0_i32, %c0_i32_0, %c0_i32_1 : i32, i32, i32
  }
  func.func @transform_3(%arg0: i32) -> (i32, i32) {
    %c0_i32 = arith.constant 0 : i32
    %c0_i32_0 = arith.constant 0 : i32
    %c0_i32_1 = arith.constant 0 : i32
    return %c0_i32, %c0_i32_0 : i32, i32
  }
  func.func @transform_4(%arg0: i32) -> (i32, i32, i32) {
    %c0_i32 = arith.constant 0 : i32
    %c0_i32_0 = arith.constant 0 : i32
    %c0_i32_1 = arith.constant 0 : i32
    %c0_i32_2 = arith.constant 0 : i32
    return %c0_i32, %c0_i32_0, %c0_i32_1 : i32, i32, i32
  }
  func.func @transform_5(%arg0: i32) -> (i32, i32) {
    %c0_i32 = arith.constant 0 : i32
    %c0_i32_0 = arith.constant 0 : i32
    return %c0_i32, %arg0 : i32, i32
  }
}

</mosaic_0001>

<bundles_post_ra>
// kernel: tpu_custom_call.1
= control target key start
LH: loop header
LB: loop body
LE: loop exit
PB: predicated region body
PF: predicated region fallthrough
CT: control target
= control target key end

     0   :  { %10 = vsyncpa [#allocation3], 0  ;;  %s2094_s0 = inlined_call_operand.vmem [shape: f32[5,256], index: 0, kind: input, shape index: {}]   ;;  %s2095_s1 = inlined_call_operand.vmem [shape: bf16[50,5], index: 1, kind: input, shape index: {}]   ;;  %s2096_s2 = inlined_call_operand.vmem [shape: bf16[5,50,50], index: 2, kind: input, shape index: {}]   ;;  %s2097_s3 = inlined_call_operand.vmem [shape: bf16[5,50], index: 3, kind: input, shape index: {}]   ;;  %s2098_s4 = inlined_call_operand.vmem [shape: f32[7,50,1], index: 4, kind: input, shape index: {}]   ;;  %s2099_s5 = inlined_call_operand.hbm [shape: f32[5,256], index: 5, kind: output, shape index: {}]  }
   0x1   :  { %12 = vsyncpa [#allocation3 + $0x1], 0  ;;  %s1755_s18 = smov 0   ;;  %s1757_s19 = smov 0  }
   0x2   :  { %s1759_s20 = smov 0   ;;  %s1761_s21 = smov 0  }
   0x3 LB: > { %s1776_s22 = sadd.s32 4294967295, %s1718_s21   ;;  %s1309_s23 = sadd.s32 4294967294, %s1718_s21   ;;  %s1718_s21 = sphi %s1761_s21, %s2105_s21   ;;  %s1714_s20 = sphi %s1759_s20, %s2104_s20   ;;  %s1710_s19 = sphi %s1757_s19, %s2103_s19   ;;  %s1706_s18 = sphi %s1755_s18, %s2102_s18  }
   0x4   : > { %s1780_s24 = sadd.s32 1, %s1718_s21   ;;  %s135_s25 = sadd.s32 1, %s1714_s20 }
   0x5   : > { %s132_s26 = ssub.s32 %s1718_s21, %s1780_s24  ;;  %p145_p0 = scmp.ne.s32.totalorder %s1714_s20, %s1710_s19 }
   0x6   : > { %p133_p1 = scmp.eq.s32.totalorder %s132_s26, 0  ;;  %p146_p2 = scmp.eq.s32.totalorder %s1776_s22, 1 }
   0x7   : > { %p151_p3 = scmp.ne.s32.totalorder %s1710_s19, %s1706_s18  ;;  %p152_p4 = scmp.eq.s32.totalorder %s1309_s23, 1 }
   0x8   : > { %s1791_s27 = scalar_select %p133_p1, %s1714_s20, %s135_s25  }
   0x9   : > { %p1793_p5 = por %p146_p2, %p145_p0  ;;  %p1797_p6 = por %p152_p4, %p151_p3 }
   0xa   : > { %p1312_p7 = scmp.ge.s32.totalorder %s1718_s21, 1  ;;  %p189_p8 = scmp.lt.s32.totalorder %s1718_s21, 3 }
   0xc   : > { %p190_p9 = pnand %p1312_p7, %p189_p8 }
   0xd   : > { %p216_p10 = scmp.lt.s32.totalorder (!%p190_p9), %s1776_s22, 1  ;;  %s213_s23 = sand.u32 (!%p190_p9), 1, %s1710_s19  }
   0xe   : > { %193 = sbr.rel (%p190_p9) target bundleno = 1590 (0x636), region = 40  ;;  %s1313_s25 = sshll.u32 (!%p190_p9), %s213_s23, 3 }
   0xf   : > { %s1429_s26 = sshll.u32 (!%p190_p9), %s1776_s22, 7  ;;  %s215_s30 = scalar_lea.vmem (!%p190_p9), [#allocation2], %s1313_s25 }
  0x10   : > { %s1250_s6 = sshll.u32 (!%p190_p9), %s215_s30, 4  ;;  %s2053_s9 = scalar_lea.hbm (!%p190_p9), %s2099_s5, %s1429_s26  ;;  %s2055_s6 = int_to_ptr.vmem [resolvable:$true] %s1250_s6 }
  0x11   : > { %s1237_s10 = scalar_lea.sflag (!%p190_p9), [#allocation3], %s213_s23  ;;  %s1724_s11 = smov (!%p190_p9), [#allocation2]  }
  0x12   : > { %s1662_s12 = sshll.u32 (!%p190_p9), %s1724_s11, 4  ;;  %s1663_s12 = int_to_ptr.vmem [resolvable:$false] %s1662_s12 }
  0x13   : > { %v236_v0 = vld [vmem:[%s2098_s4 + $0x30] sm:$0x3]  ;;  %vm303_vm0 = vcmask 1041408   ;;  %v1720_v1 = vmov 0   ;;  %s217_s7 = scalar_select %p216_p10, %s1776_s22, 1  ;;  %v1634_v2 = vld [vmem:[%s2095_s1] sm:$0xff]  }
  0x14   : > { %1632 = vset.pattern.permute.xlu0 %v1720_v1  ;;  %1633 = vset.pattern.permute.xlu1 %v1720_v1  ;;  %vm290_vm1 = vcmask 39936   ;;  %vm304_vm2 = vcmask 1042432   ;;  %v1721_v3 = vmov 65535   ;;  %v234_v5 = vld [vmem:[%s2098_s4 + $0x20] sm:$0xff]  ;;  %v235_v6 = vld [vmem:[%s2098_s4 + $0x28] sm:$0xff]  ;;  %v232_v7 = vld [vmem:[%s2098_s4 + $0x10] sm:$0xff]  ;;  %p1665_p0 = scmp.lt.s32.totalorder %s2055_s6, %s1663_s12 }
  0x15   : > { %269 = vperm.xlu0 %1632, %v236_v0   ;;  %v305_v4 = vsel %vm303_vm0, 4294967295, %v1721_v3  ;;  %s1314_s14 = sshll.u32 %s217_s7, 3  ;;  %1484 = vmatprep.mubr.msk.bf16.mxu0 %vm290_vm1, %v1634_v2  ;;  %v233_v11 = vld [vmem:[%s2098_s4 + $0x18] sm:$0xff]  ;;  %v230_v13 = vld [vmem:[%s2098_s4] sm:$0xff]  ;;  %v1635_v14 = vld [vmem:[%s2095_s1 + $0x8] sm:$0xff]   ;;  %vm453_vm3 = vcmask 408576  }
  0x16   : > { %264 = vperm.xlu1 %1633, %v235_v6   ;;  %s219_s17 = scalar_lea.vmem %s2094_s0, %s1314_s14  ;;  %v306_v9 = vsel %vm304_vm2, %v305_v4, 0  ;;  %v231_v15 = vld [vmem:[%s2098_s4 + $0x8] sm:$0xff]  ;;  %v1636_v16 = vld [vmem:[%s2095_s1 + $0x10] sm:$0xff]   ;;  %v1327_v18 = vld [vmem:[%s2098_s4 + $0x58] sm:$0xff]  ;;  %vm466_vm4 = vcmask 1040384   ;;  %vm1723_vm5 = vmmov 0  }
  0x17   : > { %v228_v8 = vld [vmem:[%s219_s17] sm:$0x1f]  ;;  %v1329_v17 = vld [vmem:[%s2098_s4 + $0x68] sm:$0x3]  ;;  %v1326_v22 = vld [vmem:[%s2098_s4 + $0x50] sm:$0xff]  ;;  %s1658_s22 = scalar_lea.vmem %s2055_s6, 128 }
  0x18   : > { %v229_v10 = vpack.c.bf16 %v228_v8, %v228_v8  ;;  %v1328_v19 = vld [vmem:[%s2098_s4 + $0x60] sm:$0xff]  ;;  %v1637_v20 = vld [vmem:[%s2095_s1 + $0x18] ss:$0 sps:$4 sm:$0x11]   ;;  %v1325_v21 = vld [vmem:[%s2098_s4 + $0x48] sm:$0xff]  ;;  %p1659_p11 = scmp.ne.s32.totalorder %s2055_s6, %s1658_s22  ;;  %s1664_s13 = scalar_lea.vmem %s1663_s12, 256 }
  0x19   : > { %259 = vperm.xlu0 %1632, %v234_v5   ;;  %v1323_v23 = vld [vmem:[%s2098_s4 + $0x38] sm:$0xff]  ;;  %v1324_v24 = vld [vmem:[%s2098_s4 + $0x40] sm:$0xff]  ;;  %v1349_v26 = vld [vmem:[%s2098_s4 + $0x90] sm:$0xff]  ;;  %p1666_p1 = scmp.lt.s32.totalorder %s1664_s13, %s1658_s22 }
  0x1a   : > { %249 = vperm.xlu1 %1633, %v232_v7   ;;  %v308_v12 = vand.u32 %v306_v9, %v229_v10  ;;  %v1351_v25 = vld [vmem:[%s2098_s4 + $0xa0] sm:$0x3]  ;;  %v1350_v27 = vld [vmem:[%s2098_s4 + $0x98] sm:$0xff]  ;;  %v1348_v29 = vld [vmem:[%s2098_s4 + $0x88] sm:$0xff]  ;;  %p1660_p12 = pnand %p1659_p11, %p1793_p5 }
  0x1b   : > { %v1347_v28 = vld [vmem:[%s2098_s4 + $0x80] sm:$0xff]  ;;  %v1345_v30 = vld [vmem:[%s2098_s4 + $0x70] sm:$0xff]  ;;  %v1346_v31 = vld [vmem:[%s2098_s4 + $0x78] sm:$0xff]  ;;  %p1667_p2 = por %p1666_p1, %p1665_p0 }
  0x1c   : > { %1482 = vmatprep.subr.bf16.mxu0 %v308_v12  ;;  %v1373_v32 = vld [vmem:[%s2098_s4 + $0xd8] sm:$0x3]  ;;  %v1371_v33 = vld [vmem:[%s2098_s4 + $0xc8] sm:$0xff]  ;;  %v1372_v34 = vld [vmem:[%s2098_s4 + $0xd0] sm:$0xff]  ;;  %p1661_p13 = pneg %p1660_p12 }
  0x1d   : > { %254 = vperm.xlu0 %1632, %v233_v11   ;;  %1483 = vmatpush3.bf16.msra.mxu0 %v308_v12  ;;  %v1369_v35 = vld [vmem:[%s2098_s4 + $0xb8] sm:$0xff]  ;;  %v1370_v36 = vld [vmem:[%s2098_s4 + $0xc0] sm:$0xff]  ;;  %v1367_v37 = vld [vmem:[%s2098_s4 + $0xa8] sm:$0xff] }
  0x1e   : > { %239 = vperm.xlu1 %1633, %v230_v13   ;;  %v1368_v38 = vld [vmem:[%s2098_s4 + $0xb0] sm:$0xff]  ;;  %v1393_v40 = vld [vmem:[%s2098_s4 + $0x100] sm:$0xff]  ;;  %v1394_v41 = vld [vmem:[%s2098_s4 + $0x108] sm:$0xff]  ;;  %p1668_p3 = pnand %p1667_p2, %p1661_p13 }
  0x1f   : > { %v1395_v39 = vld [vmem:[%s2098_s4 + $0x110] sm:$0x3]  ;;  %v1392_v43 = vld [vmem:[%s2098_s4 + $0xf8] sm:$0xff]  ;;  %v1389_v44 = vld [vmem:[%s2098_s4 + $0xe0] sm:$0xff] }
  0x20   : > { %1485 = vmatmul.mubr.msk.bf16.vlgmr.msra.gmra.mxu0 %vm290_vm1, %v1635_v14  ;;  %v1391_v42 = vld [vmem:[%s2098_s4 + $0xf0] sm:$0xff]  ;;  %v1390_v45 = vld [vmem:[%s2098_s4 + $0xe8] sm:$0xff]  ;;  %v1415_v47 = vld [vmem:[%s2098_s4 + $0x138] sm:$0xff] }
  0x21   : > { %244 = vperm.xlu0 %1632, %v231_v15   ;;  %1488 = vmatprep.mubr.msk.bf16.mxu0 %vm290_vm1, %v1636_v16  ;;  %v1417_v46 = vld [vmem:[%s2098_s4 + $0x148] sm:$0x3]  ;;  %v1416_v48 = vld [vmem:[%s2098_s4 + $0x140] sm:$0xff]  ;;  %v1414_v50 = vld [vmem:[%s2098_s4 + $0x130] sm:$0xff] }
  0x22   : > { %432 = vperm.xlu1 %1633, %v1329_v17   ;;  %v1413_v49 = vld [vmem:[%s2098_s4 + $0x128] sm:$0xff]  ;;  %v1411_v51 = vld [vmem:[%s2098_s4 + $0x118] sm:$0xff]  ;;  %v1412_v52 = vld [vmem:[%s2098_s4 + $0x120] sm:$0xff] }
  0x23   : > { %v1426_v53 = vld [vmem:[%s2098_s4 + $0x150] sm:$0xff]  ;;  %v1638_v54 = vld [vmem:[%s2096_s2] sm:$0xff]  }
  0x24   : > { %1500 = vmatprep.mubr.msk.bf16.mxu1 %vm453_vm3, %v1638_v54 }
  0x25   : > { %422 = vperm.xlu0 %1632, %v1327_v18  }
  0x26   : > { %427 = vperm.xlu1 %1633, %v1328_v19  }
  0x28   : > { %1489 = vmatmul.mubr.msk.bf16.gmra.mxu0 %vm290_vm1, %v1637_v20 }
  0x29   : > { %412 = vperm.xlu0 %1632, %v1325_v21  }
  0x2a   : > { %417 = vperm.xlu1 %1633, %v1326_v22  }
  0x2d   : > { %402 = vperm.xlu0 %1632, %v1323_v23  }
  0x2e   : > { %407 = vperm.xlu1 %1633, %v1324_v24  }
  0x31   : > { %593 = vperm.xlu0 %1632, %v1351_v25   ;;  %v1639_v25 = vld [vmem:[%s2096_s2 + $0x8] sm:$0xff]  }
  0x32   : > { %583 = vperm.xlu1 %1633, %v1349_v26   ;;  %v1640_v26 = vld [vmem:[%s2096_s2 + $0x10] sm:$0xff]  }
  0x35   : > { %588 = vperm.xlu0 %1632, %v1350_v27   ;;  %v1641_v27 = vld [vmem:[%s2096_s2 + $0x18] ss:$0 sps:$4 sm:$0x11]  }
  0x36   : > { %573 = vperm.xlu1 %1633, %v1347_v28   ;;  %v1642_v28 = vld [vmem:[%s2096_s2 + $0x1c] sm:$0xff]  }
  0x37   : > { %1516 = vmatprep.mubr.msk.bf16.mxu0 %vm453_vm3, %v1642_v28 }
  0x39   : > { %578 = vperm.xlu0 %1632, %v1348_v29  }
  0x3a   : > { %563 = vperm.xlu1 %1633, %v1345_v30  }
  0x3d   : > { %568 = vperm.xlu0 %1632, %v1346_v31  }
  0x3e   : > { %752 = vperm.xlu1 %1633, %v1373_v32  }
  0x41   : > { %742 = vperm.xlu0 %1632, %v1371_v33  }
  0x42   : > { %747 = vperm.xlu1 %1633, %v1372_v34  }
  0x45   : > { %732 = vperm.xlu0 %1632, %v1369_v35  }
  0x46   : > { %737 = vperm.xlu1 %1633, %v1370_v36  }
  0x49   : > { %722 = vperm.xlu0 %1632, %v1367_v37  }
  0x4a   : > { %727 = vperm.xlu1 %1633, %v1368_v38  }
  0x4d   : > { %911 = vperm.xlu0 %1632, %v1395_v39  }
  0x4e   : > { %901 = vperm.xlu1 %1633, %v1393_v40  }
  0x51   : > { %906 = vperm.xlu0 %1632, %v1394_v41  }
  0x52   : > { %891 = vperm.xlu1 %1633, %v1391_v42  }
  0x55   : > { %896 = vperm.xlu0 %1632, %v1392_v43  }
  0x56   : > { %881 = vperm.xlu1 %1633, %v1389_v44  }
  0x59   : > { %886 = vperm.xlu0 %1632, %v1390_v45  }
  0x5a   : > { %1070 = vperm.xlu1 %1633, %v1417_v46  }
  0x5d   : > { %1060 = vperm.xlu0 %1632, %v1415_v47  }
  0x5e   : > { %1065 = vperm.xlu1 %1633, %v1416_v48  }
  0x61   : > { %1050 = vperm.xlu0 %1632, %v1413_v49  }
  0x62   : > { %1055 = vperm.xlu1 %1633, %v1414_v50  }
  0x65   : > { %1040 = vperm.xlu0 %1632, %v1411_v51  }
  0x66   : > { %1045 = vperm.xlu1 %1633, %v1412_v52  }
  0x69   : > { %1186 = vperm.xlu0 %1632, %v1426_v53  }
  0x90   : > { %v270_v55 = vpop.permute.xlu0 %269 }
  0x91   : > { %v265_v60 = vpop.permute.xlu1 %264 }
  0x94   : > { %v260_v58 = vpop.permute.xlu0 %259 }
  0x95   : > { %v250_v3 = vpop.permute.xlu1 %249 }
  0x98   : > { %v255_v0 = vpop.permute.xlu0 %254 }
  0x99   : > { %v240_v17 = vpop.permute.xlu1 %239 }
  0x9c   : > { %v245_v12 = vpop.permute.xlu0 %244 }
  0x9d   : > { %v433_v29 = vpop.permute.xlu1 %432 }
  0xa0   : > { %v423_v34 = vpop.permute.xlu0 %422 }
  0xa1   : > { %v428_v32 = vpop.permute.xlu1 %427 }
  0xa4   : > { %v413_v41 = vpop.permute.xlu0 %412 }
  0xa5   : > { %v418_v38 = vpop.permute.xlu1 %417 }
  0xa9   : > { %v408_v50 = vpop.permute.xlu1 %407 }
  0xe0   : > { %v1486_v56 = vpop.f32.mrf.mxu0 }
  0xe1   : > { %v353_v9 = vadd.f32 %v1486_v56, %v250_v3 }
  0xe2   : > { %v344_v57 = vpop.f32.mrf.mxu0 }
  0xe3   : > { %v376_v18 = vmax.f32 %v353_v9, 0.0  ;;  %v345_v19 = vadd.f32 %v344_v57, %v240_v17 }
  0xe4   : > { %v1487_v59 = vpop.f32.mrf.mxu0 }
  0xe5   : > { %v356_v5 = vadd.f32 %v1487_v59, %v255_v0  ;;  %v374_v23 = vmax.f32 %v345_v19, 0.0  ;;  %v1644_v0 = vld [vmem:[%s2096_s2 + $0x2c] sm:$0xff]  }
  0xe6   : > { %v347_v61 = vpop.f32.mrf.mxu0 }
  0xe7   : > { %v377_v13 = vmax.f32 %v356_v5, 0.0  ;;  %v348_v14 = vadd.f32 %v347_v61, %v245_v12 }
  0xe8   : > { %v1490_v62 = vpop.f32.mrf.mxu0 }
  0xe9   : > { %v369_v63 = vadd.f32 %v1490_v62, %v270_v55  ;;  %v389_v21 = vpack.c.bf16 %v377_v13, %v376_v18  ;;  %v375_v22 = vmax.f32 %v348_v14, 0.0  ;;  %v403_v55 = vpop.permute.xlu0 %402 }
  0xea   : > { %v360_v1 = vpop.f32.mrf.mxu0 }
  0xeb   : > { %v380_v2 = vmax.f32 %v369_v63, 0.0  ;;  %v361_v6 = vadd.f32 %v360_v1, %v260_v58  ;;  %v388_v24 = vpack.c.bf16 %v375_v22, %v374_v23  ;;  %v1643_v63 = vld [vmem:[%s2096_s2 + $0x24] sm:$0xff]   ;;  %v1645_v1 = vld [vmem:[%s2096_s2 + $0x34] ss:$0 sps:$4 sm:$0x11]  }
  0xec   : > { %v1491_v4 = vpop.f32.mrf.mxu0 }
  0xed   : > { %v391_v7 = vpack.c.bf16 %v380_v2, %v380_v2  ;;  %v378_v15 = vmax.f32 %v361_v6, 0.0  ;;  %v1646_v2 = vld [vmem:[%s2096_s2 + $0x38] sm:$0xff]   ;;  %v594_v3 = vpop.permute.xlu0 %593 }
  0xee   : > { %v363_v8 = vpop.f32.mrf.mxu0 }
  0xef   : > { %v364_v10 = vadd.f32 %v363_v8, %v265_v60  ;;  %1584 = vmatprep.subr.msk.bf16.mxu1 %vm466_vm4, %v391_v7  ;;  %v468_v11 = vsel %vm466_vm4, %v391_v7, 0  ;;  %v584_v8 = vpop.permute.xlu1 %583 }
  0xf0   : > { %1493 = vmatpush3.bf16.msra.mxu1 %v468_v11 }
  0xf1   : > { %v379_v16 = vmax.f32 %v364_v10, 0.0  ;;  %v589_v6 = vpop.permute.xlu0 %588 }
  0xf3   : > { %v390_v20 = vpack.c.bf16 %v379_v16, %v378_v15  ;;  %v574_v15 = vpop.permute.xlu1 %573 }
  0xf5   : > { %1494 = vmatprep.subr.bf16.mxu1 %v390_v20  ;;  %v579_v12 = vpop.permute.xlu0 %578 }
  0xf6   : > { %1495 = vmatpush3.bf16.msra.mxu1 %v390_v20 }
  0xf7   : > { %1496 = vmatprep.subr.bf16.mxu1 %v389_v21 }
  0xfa   : > { %1497 = vmatpush3.bf16.msra.mxu1 %v389_v21 }
  0xfb   : > { %1498 = vmatprep.subr.bf16.mxu1 %v388_v24 }
  0xfe   : > { %1499 = vmatpush3.bf16.msra.mxu1 %v388_v24  ;;  %v569_v24 = vpop.permute.xlu0 %568 }
 0x101   : > { %1501 = vmatmul.mubr.msk.bf16.vlgmr.msra.gmra.mxu1 %vm453_vm3, %v1639_v25 }
 0x102   : > { %1504 = vmatprep.mubr.msk.bf16.mxu1 %vm453_vm3, %v1640_v26 }
 0x109   : > { %1505 = vmatmul.mubr.msk.bf16.gmra.mxu1 %vm453_vm3, %v1641_v27 }
 0x10a   : > { %1532 = vmatprep.mubr.msk.bf16.mxu1 %vm453_vm3, %v1646_v2 }
 0x1c1   : > { %v1502_v30 = vpop.f32.mrf.mxu1 }
 0x1c2   : > { %v513_v47 = vadd.f32 %v1502_v30, %v413_v41 }
 0x1c3   : > { %v504_v31 = vpop.f32.mrf.mxu1 }
 0x1c4   : > { %v536_v56 = vmax.f32 %v513_v47, 0.0  ;;  %v505_v57 = vadd.f32 %v504_v31, %v403_v55 }
 0x1c5   : > { %v1503_v33 = vpop.f32.mrf.mxu1 }
 0x1c6   : > { %v516_v43 = vadd.f32 %v1503_v33, %v418_v38  ;;  %v534_v61 = vmax.f32 %v505_v57, 0.0  ;;  %v1648_v38 = vld [vmem:[%s2096_s2 + $0x48] sm:$0xff]  }
 0x1c7   : > { %v507_v35 = vpop.f32.mrf.mxu1 }
 0x1c8   : > { %v537_v51 = vmax.f32 %v516_v43, 0.0  ;;  %v508_v52 = vadd.f32 %v507_v35, %v408_v50 }
 0x1c9   : > { %v1506_v36 = vpop.f32.mrf.mxu1 }
 0x1ca   : > { %v529_v37 = vadd.f32 %v1506_v36, %v433_v29  ;;  %v550_v59 = vpack.c.bf16 %v537_v51, %v536_v56  ;;  %v535_v60 = vmax.f32 %v508_v52, 0.0  ;;  %v564_v29 = vpop.permute.xlu1 %563 }
 0x1cb   : > { %v520_v39 = vpop.f32.mrf.mxu1 }
 0x1cc   : > { %v540_v40 = vmax.f32 %v529_v37, 0.0  ;;  %v521_v45 = vadd.f32 %v520_v39, %v423_v34  ;;  %v549_v62 = vpack.c.bf16 %v535_v60, %v534_v61  ;;  %v1647_v37 = vld [vmem:[%s2096_s2 + $0x40] sm:$0xff]   ;;  %v1649_v39 = vld [vmem:[%s2096_s2 + $0x50] ss:$0 sps:$4 sm:$0x11]  }
 0x1cd   : > { %v1507_v42 = vpop.f32.mrf.mxu1 }
 0x1ce   : > { %v552_v44 = vpack.c.bf16 %v540_v40, %v540_v40  ;;  %v538_v53 = vmax.f32 %v521_v45, 0.0  ;;  %v1650_v40 = vld [vmem:[%s2096_s2 + $0x54] sm:$0xff]   ;;  %v753_v41 = vpop.permute.xlu1 %752 }
 0x1cf   : > { %v523_v46 = vpop.f32.mrf.mxu1 }
 0x1d0   : > { %v524_v48 = vadd.f32 %v523_v46, %v428_v32  ;;  %1585 = vmatprep.subr.msk.bf16.mxu0 %vm466_vm4, %v552_v44  ;;  %v627_v49 = vsel %vm466_vm4, %v552_v44, 0  ;;  %v743_v46 = vpop.permute.xlu0 %742 }
 0x1d1   : > { %1509 = vmatpush3.bf16.msra.mxu0 %v627_v49 }
 0x1d2   : > { %v539_v54 = vmax.f32 %v524_v48, 0.0  ;;  %v748_v44 = vpop.permute.xlu1 %747 }
 0x1d4   : > { %v551_v58 = vpack.c.bf16 %v539_v54, %v538_v53  ;;  %v733_v53 = vpop.permute.xlu0 %732 }
 0x1d6   : > { %1510 = vmatprep.subr.bf16.mxu0 %v551_v58  ;;  %v738_v50 = vpop.permute.xlu1 %737 }
 0x1d7   : > { %1511 = vmatpush3.bf16.msra.mxu0 %v551_v58 }
 0x1d8   : > { %1512 = vmatprep.subr.bf16.mxu0 %v550_v59 }
 0x1db   : > { %1513 = vmatpush3.bf16.msra.mxu0 %v550_v59 }
 0x1dc   : > { %1514 = vmatprep.subr.bf16.mxu0 %v549_v62 }
 0x1df   : > { %1515 = vmatpush3.bf16.msra.mxu0 %v549_v62  ;;  %v728_v62 = vpop.permute.xlu1 %727 }
 0x1e2   : > { %1517 = vmatmul.mubr.msk.bf16.vlgmr.msra.gmra.mxu0 %vm453_vm3, %v1643_v63 }
 0x1e3   : > { %1520 = vmatprep.mubr.msk.bf16.mxu0 %vm453_vm3, %v1644_v0 }
 0x1ea   : > { %1521 = vmatmul.mubr.msk.bf16.gmra.mxu0 %vm453_vm3, %v1645_v1 }
 0x1eb   : > { %1548 = vmatprep.mubr.msk.bf16.mxu0 %vm453_vm3, %v1650_v40 }
 0x2a2   : > { %v1518_v4 = vpop.f32.mrf.mxu0 }
 0x2a3   : > { %v672_v21 = vadd.f32 %v1518_v4, %v574_v15 }
 0x2a4   : > { %v663_v5 = vpop.f32.mrf.mxu0 }
 0x2a5   : > { %v695_v30 = vmax.f32 %v672_v21, 0.0  ;;  %v664_v31 = vadd.f32 %v663_v5, %v564_v29 }
 0x2a6   : > { %v1519_v7 = vpop.f32.mrf.mxu0 }
 0x2a7   : > { %v675_v17 = vadd.f32 %v1519_v7, %v579_v12  ;;  %v693_v35 = vmax.f32 %v664_v31, 0.0  ;;  %v1652_v12 = vld [vmem:[%s2096_s2 + $0x64] sm:$0xff]  }
 0x2a8   : > { %v666_v9 = vpop.f32.mrf.mxu0 }
 0x2a9   : > { %v696_v25 = vmax.f32 %v675_v17, 0.0  ;;  %v667_v26 = vadd.f32 %v666_v9, %v569_v24 }
 0x2aa   : > { %v1522_v10 = vpop.f32.mrf.mxu0 }
 0x2ab   : > { %v688_v11 = vadd.f32 %v1522_v10, %v594_v3  ;;  %v709_v33 = vpack.c.bf16 %v696_v25, %v695_v30  ;;  %v694_v34 = vmax.f32 %v667_v26, 0.0  ;;  %v723_v3 = vpop.permute.xlu0 %722 }
 0x2ac   : > { %v679_v13 = vpop.f32.mrf.mxu0 }
 0x2ad   : > { %v699_v14 = vmax.f32 %v688_v11, 0.0  ;;  %v680_v19 = vadd.f32 %v679_v13, %v584_v8  ;;  %v708_v36 = vpack.c.bf16 %v694_v34, %v693_v35  ;;  %v1651_v11 = vld [vmem:[%s2096_s2 + $0x5c] sm:$0xff]   ;;  %v1653_v13 = vld [vmem:[%s2096_s2 + $0x6c] ss:$0 sps:$4 sm:$0x11]  }
 0x2ae   : > { %v1523_v16 = vpop.f32.mrf.mxu0 }
 0x2af   : > { %v711_v18 = vpack.c.bf16 %v699_v14, %v699_v14  ;;  %v697_v27 = vmax.f32 %v680_v19, 0.0  ;;  %v1654_v14 = vld [vmem:[%s2096_s2 + $0x70] sm:$0xff]   ;;  %v912_v15 = vpop.permute.xlu0 %911 }
 0x2b0   : > { %v682_v20 = vpop.f32.mrf.mxu0 }
 0x2b1   : > { %v683_v22 = vadd.f32 %v682_v20, %v589_v6  ;;  %1586 = vmatprep.subr.msk.bf16.mxu1 %vm466_vm4, %v711_v18  ;;  %v786_v23 = vsel %vm466_vm4, %v711_v18, 0  ;;  %v902_v20 = vpop.permute.xlu1 %901 }
 0x2b2   : > { %1525 = vmatpush3.bf16.msra.mxu1 %v786_v23 }
 0x2b3   : > { %v698_v28 = vmax.f32 %v683_v22, 0.0  ;;  %v907_v18 = vpop.permute.xlu0 %906 }
 0x2b5   : > { %v710_v32 = vpack.c.bf16 %v698_v28, %v697_v27  ;;  %v892_v27 = vpop.permute.xlu1 %891 }
 0x2b7   : > { %1526 = vmatprep.subr.bf16.mxu1 %v710_v32  ;;  %v897_v24 = vpop.permute.xlu0 %896 }
 0x2b8   : > { %1527 = vmatpush3.bf16.msra.mxu1 %v710_v32 }
 0x2b9   : > { %1528 = vmatprep.subr.bf16.mxu1 %v709_v33 }
 0x2bc   : > { %1529 = vmatpush3.bf16.msra.mxu1 %v709_v33 }
 0x2bd   : > { %1530 = vmatprep.subr.bf16.mxu1 %v708_v36 }
 0x2c0   : > { %1531 = vmatpush3.bf16.msra.mxu1 %v708_v36  ;;  %v887_v36 = vpop.permute.xlu0 %886 }
 0x2c3   : > { %1533 = vmatmul.mubr.msk.bf16.vlgmr.msra.gmra.mxu1 %vm453_vm3, %v1647_v37 }
 0x2c4   : > { %1536 = vmatprep.mubr.msk.bf16.mxu1 %vm453_vm3, %v1648_v38 }
 0x2cb   : > { %1537 = vmatmul.mubr.msk.bf16.gmra.mxu1 %vm453_vm3, %v1649_v39 }
 0x2cc   : > { %1564 = vmatprep.mubr.msk.bf16.mxu1 %vm453_vm3, %v1654_v14 }
 0x383   : > { %v1534_v42 = vpop.f32.mrf.mxu1 }
 0x384   : > { %v831_v59 = vadd.f32 %v1534_v42, %v733_v53 }
 0x385   : > { %v822_v43 = vpop.f32.mrf.mxu1 }
 0x386   : > { %v854_v4 = vmax.f32 %v831_v59, 0.0  ;;  %v823_v5 = vadd.f32 %v822_v43, %v723_v3  ;;  %v1061_v59 = vpop.permute.xlu0 %1060 }
 0x387   : > { %v1535_v45 = vpop.f32.mrf.mxu1 }
 0x388   : > { %v834_v55 = vadd.f32 %v1535_v45, %v738_v50  ;;  %v852_v9 = vmax.f32 %v823_v5, 0.0  ;;  %v1656_v50 = vld [vmem:[%s2096_s2 + $0x80] sm:$0xff]  }
 0x389   : > { %v825_v47 = vpop.f32.mrf.mxu1 }
 0x38a   : > { %v855_v63 = vmax.f32 %v834_v55, 0.0  ;;  %v826_v0 = vadd.f32 %v825_v47, %v728_v62 }
 0x38b   : > { %v1538_v48 = vpop.f32.mrf.mxu1 }
 0x38c   : > { %v847_v49 = vadd.f32 %v1538_v48, %v753_v41  ;;  %v868_v7 = vpack.c.bf16 %v855_v63, %v854_v4  ;;  %v853_v8 = vmax.f32 %v826_v0, 0.0  ;;  %v882_v41 = vpop.permute.xlu1 %881  ;;  %v1051_v4 = vpop.permute.xlu0 %1050 }
 0x38d   : > { %v838_v51 = vpop.f32.mrf.mxu1 }
 0x38e   : > { %v858_v52 = vmax.f32 %v847_v49, 0.0  ;;  %v839_v57 = vadd.f32 %v838_v51, %v743_v46  ;;  %v867_v10 = vpack.c.bf16 %v853_v8, %v852_v9  ;;  %v1655_v49 = vld [vmem:[%s2096_s2 + $0x78] sm:$0xff]   ;;  %v1657_v51 = vld [vmem:[%s2096_s2 + $0x88] ss:$0 sps:$4 sm:$0x11]  }
 0x38f   : > { %v1539_v54 = vpop.f32.mrf.mxu1 }
 0x390   : > { %v870_v56 = vpack.c.bf16 %v858_v52, %v858_v52  ;;  %v856_v1 = vmax.f32 %v839_v57, 0.0  ;;  %v1722_v52 = vmov 0.0   ;;  %v1071_v53 = vpop.permute.xlu1 %1070 }
 0x391   : > { %v841_v58 = vpop.f32.mrf.mxu1 }
 0x392   : > { %v842_v60 = vadd.f32 %v841_v58, %v748_v44  ;;  %1587 = vmatprep.subr.msk.bf16.mxu0 %vm466_vm4, %v870_v56  ;;  %v945_v61 = vsel %vm466_vm4, %v870_v56, 0 }
 0x393   : > { %1541 = vmatpush3.bf16.msra.mxu0 %v945_v61 }
 0x394   : > { %v857_v2 = vmax.f32 %v842_v60, 0.0  ;;  %v1066_v57 = vpop.permute.xlu1 %1065 }
 0x396   : > { %v869_v6 = vpack.c.bf16 %v857_v2, %v856_v1 }
 0x398   : > { %1542 = vmatprep.subr.bf16.mxu0 %v869_v6  ;;  %v1056_v0 = vpop.permute.xlu1 %1055 }
 0x399   : > { %1543 = vmatpush3.bf16.msra.mxu0 %v869_v6 }
 0x39a   : > { %1544 = vmatprep.subr.bf16.mxu0 %v868_v7 }
 0x39d   : > { %1545 = vmatpush3.bf16.msra.mxu0 %v868_v7 }
 0x39e   : > { %1546 = vmatprep.subr.bf16.mxu0 %v867_v10 }
 0x3a1   : > { %1547 = vmatpush3.bf16.msra.mxu0 %v867_v10 }
 0x3a2   : > { %1572 = vmatprep.subr.bf16.mxu0 %v1722_v52 }
 0x3a4   : > { %1549 = vmatmul.mubr.msk.bf16.vlgmr.msra.gmra.mxu0 %vm453_vm3, %v1651_v11 }
 0x3a5   : > { %1552 = vmatprep.mubr.msk.bf16.mxu0 %vm453_vm3, %v1652_v12  ;;  %v1046_v12 = vpop.permute.xlu1 %1045 }
 0x3ac   : > { %1553 = vmatmul.mubr.msk.bf16.gmra.mxu0 %vm453_vm3, %v1653_v13 }
 0x3ad   : > { %1580 = vmatprep.mubr.msk.bf16.mxu0 %vm1723_vm5, %v1722_v52 }
 0x464   : > { %v1550_v16 = vpop.f32.mrf.mxu0 }
 0x465   : > { %v990_v33 = vadd.f32 %v1550_v16, %v892_v27  ;;  %v1041_v16 = vpop.permute.xlu0 %1040 }
 0x466   : > { %v981_v17 = vpop.f32.mrf.mxu0 }
 0x467   : > { %v1013_v42 = vmax.f32 %v990_v33, 0.0  ;;  %v982_v43 = vadd.f32 %v981_v17, %v882_v41 }
 0x468   : > { %v1551_v19 = vpop.f32.mrf.mxu0 }
 0x469   : > { %v993_v29 = vadd.f32 %v1551_v19, %v897_v24  ;;  %v1011_v47 = vmax.f32 %v982_v43, 0.0  ;;  %v1187_v24 = vpop.permute.xlu0 %1186 }
 0x46a   : > { %v984_v21 = vpop.f32.mrf.mxu0 }
 0x46b   : > { %v1014_v37 = vmax.f32 %v993_v29, 0.0  ;;  %v985_v38 = vadd.f32 %v984_v21, %v887_v36 }
 0x46c   : > { %v1554_v22 = vpop.f32.mrf.mxu0 }
 0x46d   : > { %v1006_v23 = vadd.f32 %v1554_v22, %v912_v15  ;;  %v1027_v45 = vpack.c.bf16 %v1014_v37, %v1013_v42  ;;  %v1012_v46 = vmax.f32 %v985_v38, 0.0 }
 0x46e   : > { %v997_v25 = vpop.f32.mrf.mxu0 }
 0x46f   : > { %v1017_v26 = vmax.f32 %v1006_v23, 0.0  ;;  %v998_v31 = vadd.f32 %v997_v25, %v902_v20  ;;  %v1026_v48 = vpack.c.bf16 %v1012_v46, %v1011_v47  ;;  %v1177_v23 = vld [vmem:[%s2097_s3] sm:$0x7] }
 0x470   : > { %v1555_v28 = vpop.f32.mrf.mxu0 }
 0x471   : > { %v1029_v30 = vpack.c.bf16 %v1017_v26, %v1017_v26  ;;  %v1015_v39 = vmax.f32 %v998_v31, 0.0 }
 0x472   : > { %v1000_v32 = vpop.f32.mrf.mxu0 }
 0x473   : > { %v1001_v34 = vadd.f32 %v1000_v32, %v907_v18  ;;  %1588 = vmatprep.subr.msk.bf16.mxu1 %vm466_vm4, %v1029_v30  ;;  %v1104_v35 = vsel %vm466_vm4, %v1029_v30, 0 }
 0x474   : > { %1557 = vmatpush3.bf16.msra.mxu1 %v1104_v35 }
 0x475   : > { %v1016_v40 = vmax.f32 %v1001_v34, 0.0 }
 0x477   : > { %v1028_v44 = vpack.c.bf16 %v1016_v40, %v1015_v39 }
 0x479   : > { %1558 = vmatprep.subr.bf16.mxu1 %v1028_v44 }
 0x47a   : > { %1559 = vmatpush3.bf16.msra.mxu1 %v1028_v44 }
 0x47b   : > { %1560 = vmatprep.subr.bf16.mxu1 %v1027_v45 }
 0x47e   : > { %1561 = vmatpush3.bf16.msra.mxu1 %v1027_v45 }
 0x47f   : > { %1562 = vmatprep.subr.bf16.mxu1 %v1026_v48 }
 0x482   : > { %1563 = vmatpush3.bf16.msra.mxu1 %v1026_v48 }
 0x485   : > { %1565 = vmatmul.mubr.msk.bf16.vlgmr.msra.gmra.mxu1 %vm453_vm3, %v1655_v49 }
 0x486   : > { %1568 = vmatprep.mubr.msk.bf16.mxu1 %vm453_vm3, %v1656_v50 }
 0x48d   : > { %1569 = vmatmul.mubr.msk.bf16.gmra.mxu1 %vm453_vm3, %v1657_v51 }
 0x545   : > { %v1566_v54 = vpop.f32.mrf.mxu1 }
 0x546   : > { %v1149_v9 = vadd.f32 %v1566_v54, %v1051_v4 }
 0x547   : > { %v1140_v55 = vpop.f32.mrf.mxu1 }
 0x548   : > { %v1172_v17 = vmax.f32 %v1149_v9, 0.0  ;;  %v1141_v18 = vadd.f32 %v1140_v55, %v1041_v16 }
 0x549   : > { %v1567_v56 = vpop.f32.mrf.mxu1 }
 0x54a   : > { %v1152_v6 = vadd.f32 %v1567_v56, %v1056_v0  ;;  %v1170_v21 = vmax.f32 %v1141_v18, 0.0 }
 0x54b   : > { %v1143_v58 = vpop.f32.mrf.mxu1 }
 0x54c   : > { %v1173_v13 = vmax.f32 %v1152_v6, 0.0  ;;  %v1144_v14 = vadd.f32 %v1143_v58, %v1046_v12 }
 0x54d   : > { %v1570_v60 = vpop.f32.mrf.mxu1 }
 0x54e   : > { %v1165_v61 = vadd.f32 %v1570_v60, %v1071_v53  ;;  %v1179_v19 = vpack.c.bf16 %v1173_v13, %v1172_v17  ;;  %v1171_v20 = vmax.f32 %v1144_v14, 0.0 }
 0x54f   : > { %v1156_v62 = vpop.f32.mrf.mxu1 }
 0x550   : > { %v1176_v63 = vmax.f32 %v1165_v61, 0.0  ;;  %v1157_v3 = vadd.f32 %v1156_v62, %v1061_v59  ;;  %v1178_v22 = vpack.c.bf16 %v1171_v20, %v1170_v21 }
 0x551   : > { %v1571_v1 = vpop.f32.mrf.mxu1 }
 0x552   : > { %v1181_v2 = vpack.c.bf16 %v1176_v63, %v1176_v63  ;;  %v1174_v10 = vmax.f32 %v1157_v3, 0.0 }
 0x553   : > { %v1159_v5 = vpop.f32.mrf.mxu1 }
 0x554   : > { %v1160_v7 = vadd.f32 %v1159_v5, %v1066_v57  ;;  %v1193_v8 = vsel %vm466_vm4, %v1181_v2, 0 }
 0x555   : > { %1573 = vmatpush3.bf16.msra.mxu0 %v1193_v8 }
 0x556   : > { %v1175_v11 = vmax.f32 %v1160_v7, 0.0  ;;  %1574 = vmatprep.subr.bf16.mxu0 %v1722_v52 }
 0x558   : > { %v1180_v15 = vpack.c.bf16 %v1175_v11, %v1174_v10 }
 0x55a   : > { %1575 = vmatpush3.bf16.msra.mxu0 %v1180_v15 }
 0x55b   : > { %1576 = vmatprep.subr.bf16.mxu0 %v1722_v52 }
 0x55e   : > { %1577 = vmatpush3.bf16.msra.mxu0 %v1179_v19 }
 0x55f   : > { %1578 = vmatprep.subr.bf16.mxu0 %v1722_v52 }
 0x562   : > { %1579 = vmatpush3.bf16.msra.mxu0 %v1178_v22 }
 0x565   : > { %1581 = vmatmul.mubr.msk.bf16.vlgmr.msra.gmra.mxu0 %vm453_vm3, %v1177_v23 }
 0x625   : > { %v1229_v25 = vpop.f32.mrf.mxu0 }
 0x626   : > { %v1230_v26 = vadd.f32 %v1229_v25, %v1187_v24 }
 0x627   : > { %v1582_v27 = vpop.f32.mrf.mxu0 }
 0x628   : > { %1235 = vst [vmem:[%s215_s30] sm:$0x1f] %v1230_v26 }
 0x629   : > { %v1232_v28 = vpop.f32.mrf.mxu0 }
 0x62a   : > { %1671 = shalt.err (!%p1668_p3)
}
 0x62b   : > { %s1672_s14 = scalar_lea.hbm %s2053_s9, 128  ;;  %s1676_s17 = scalar_lea.hbm %s2099_s5, 256 }
 0x62c   : > { %p1673_p4 = scmp.ne.s32.totalorder %s2053_s9, %s1672_s14  ;;  %p1677_p9 = scmp.lt.s32.totalorder %s2053_s9, %s2099_s5 }
 0x62d   : > { %p1678_p10 = scmp.lt.s32.totalorder %s1676_s17, %s1672_s14 }
 0x62e   : > { %p1674_p7 = pnand %p1673_p4, %p1793_p5 }
 0x62f   : > { %p1679_p11 = por %p1678_p10, %p1677_p9 }
 0x630   : > { %p1675_p8 = pneg %p1674_p7 }
 0x632   : > { %p1680_p12 = pnand %p1679_p11, %p1675_p8 }
 0x634   : > { %1683 = shalt.err (!%p1680_p12)
}
 0x635   : > { %1589 = dma.vmem_to_hbm [thread:$0]  (%p1793_p5), %s2055_s6, 128, %s2053_s9, %s1237_s10   ;;  %v1583_v29 = vpop.f32.mrf.mxu0 }
 0x636 PF: > { %p1595_p13 = scmp.ge.s32.totalorder %s1718_s21, 2  ;;  %s1262_s26 = sand.u32 1, %s1706_s18  }
 0x637   : > { %s1263_s30 = scalar_lea.sflag [#allocation3], %s1262_s26 }
 0x638   : > { %p1592_p0 = pnand %p1595_p13, %p1797_p6 }
 0x63a   : > { %p1593_p1 = pneg %p1592_p0 }
 0x63c   : > { %1701 = dma.done.wait (%p1593_p1), %s1263_s30, 128  }
 0x63d   : > { %1703 = vsyncadd (%p1593_p1), %s1263_s30, 4294967168  ;;  %p15_p2 = scmp.ge.s32.totalorder %s1780_s24, 4   ;;  %s2102_s18 = smov %s1710_s19 }
 0x63e   : > { %s2103_s19 = smov %s1714_s20  ;;  %s2104_s20 = smov %s1791_s27 }
 0x63f   : > { %s2105_s21 = smov %s1780_s24  ;;  %17 = sbr.rel (!%p15_p2) target bundleno = 3 (0x3), region = 85 }
 0x644   :  { %1268 = vsyncpa [#allocation3], 1 }
 0x645   :  { %1270 = vsyncpa [#allocation3 + $0x1], 1 }

// kernel: tpu_custom_call.1
= control target key start
LH: loop header
LB: loop body
LE: loop exit
PB: predicated region body
PF: predicated region fallthrough
CT: control target
= control target key end

     0   :  { %10 = vsyncpa [#allocation3], 0  ;;  %s2094_s0 = inlined_call_operand.vmem [shape: f32[5,256], index: 0, kind: input, shape index: {}]   ;;  %s2095_s1 = inlined_call_operand.vmem [shape: bf16[50,5], index: 1, kind: input, shape index: {}]   ;;  %s2096_s2 = inlined_call_operand.vmem [shape: bf16[5,50,50], index: 2, kind: input, shape index: {}]   ;;  %s2097_s3 = inlined_call_operand.vmem [shape: bf16[5,50], index: 3, kind: input, shape index: {}]   ;;  %s2098_s4 = inlined_call_operand.vmem [shape: f32[7,50,1], index: 4, kind: input, shape index: {}]   ;;  %s2099_s5 = inlined_call_operand.hbm [shape: f32[5,256], index: 5, kind: output, shape index: {}]  }
   0x1   :  { %12 = vsyncpa [#allocation3 + $0x1], 0  ;;  %s1755_s18 = smov 0   ;;  %s1757_s19 = smov 0  }
   0x2   :  { %s1759_s20 = smov 0   ;;  %s1761_s21 = smov 0  }
   0x3 LB: > { %s1776_s22 = sadd.s32 4294967295, %s1718_s21   ;;  %s1309_s23 = sadd.s32 4294967294, %s1718_s21   ;;  %s1718_s21 = sphi %s1761_s21, %s2105_s21   ;;  %s1714_s20 = sphi %s1759_s20, %s2104_s20   ;;  %s1710_s19 = sphi %s1757_s19, %s2103_s19   ;;  %s1706_s18 = sphi %s1755_s18, %s2102_s18  }
   0x4   : > { %s1780_s24 = sadd.s32 1, %s1718_s21   ;;  %s135_s25 = sadd.s32 1, %s1714_s20 }
   0x5   : > { %s132_s26 = ssub.s32 %s1718_s21, %s1780_s24  ;;  %p145_p0 = scmp.ne.s32.totalorder %s1714_s20, %s1710_s19 }
   0x6   : > { %p133_p1 = scmp.eq.s32.totalorder %s132_s26, 0  ;;  %p146_p2 = scmp.eq.s32.totalorder %s1776_s22, 1 }
   0x7   : > { %p151_p3 = scmp.ne.s32.totalorder %s1710_s19, %s1706_s18  ;;  %p152_p4 = scmp.eq.s32.totalorder %s1309_s23, 1 }
   0x8   : > { %s1791_s27 = scalar_select %p133_p1, %s1714_s20, %s135_s25  }
   0x9   : > { %p1793_p5 = por %p146_p2, %p145_p0  ;;  %p1797_p6 = por %p152_p4, %p151_p3 }
   0xa   : > { %p1312_p7 = scmp.ge.s32.totalorder %s1718_s21, 1  ;;  %p189_p8 = scmp.lt.s32.totalorder %s1718_s21, 3 }
   0xc   : > { %p190_p9 = pnand %p1312_p7, %p189_p8 }
   0xd   : > { %p216_p10 = scmp.lt.s32.totalorder (!%p190_p9), %s1776_s22, 1  ;;  %s213_s23 = sand.u32 (!%p190_p9), 1, %s1710_s19  }
   0xe   : > { %193 = sbr.rel (%p190_p9) target bundleno = 1590 (0x636), region = 40  ;;  %s1313_s25 = sshll.u32 (!%p190_p9), %s213_s23, 3 }
   0xf   : > { %s1429_s26 = sshll.u32 (!%p190_p9), %s1776_s22, 7  ;;  %s215_s30 = scalar_lea.vmem (!%p190_p9), [#allocation2], %s1313_s25 }
  0x10   : > { %s1250_s6 = sshll.u32 (!%p190_p9), %s215_s30, 4  ;;  %s2053_s9 = scalar_lea.hbm (!%p190_p9), %s2099_s5, %s1429_s26  ;;  %s2055_s6 = int_to_ptr.vmem [resolvable:$true] %s1250_s6 }
  0x11   : > { %s1237_s10 = scalar_lea.sflag (!%p190_p9), [#allocation3], %s213_s23  ;;  %s1724_s11 = smov (!%p190_p9), [#allocation2]  }
  0x12   : > { %s1662_s12 = sshll.u32 (!%p190_p9), %s1724_s11, 4  ;;  %s1663_s12 = int_to_ptr.vmem [resolvable:$false] %s1662_s12 }
  0x13   : > { %v236_v0 = vld [vmem:[%s2098_s4 + $0x30] sm:$0x3]  ;;  %vm303_vm0 = vcmask 1041408   ;;  %v1720_v1 = vmov 0   ;;  %s217_s7 = scalar_select %p216_p10, %s1776_s22, 1  ;;  %v1634_v2 = vld [vmem:[%s2095_s1] sm:$0xff]  }
  0x14   : > { %1632 = vset.pattern.permute.xlu0 %v1720_v1  ;;  %1633 = vset.pattern.permute.xlu1 %v1720_v1  ;;  %vm290_vm1 = vcmask 39936   ;;  %vm304_vm2 = vcmask 1042432   ;;  %v1721_v3 = vmov 65535   ;;  %v234_v5 = vld [vmem:[%s2098_s4 + $0x20] sm:$0xff]  ;;  %v235_v6 = vld [vmem:[%s2098_s4 + $0x28] sm:$0xff]  ;;  %v232_v7 = vld [vmem:[%s2098_s4 + $0x10] sm:$0xff]  ;;  %p1665_p0 = scmp.lt.s32.totalorder %s2055_s6, %s1663_s12 }
  0x15   : > { %269 = vperm.xlu0 %1632, %v236_v0   ;;  %v305_v4 = vsel %vm303_vm0, 4294967295, %v1721_v3  ;;  %s1314_s14 = sshll.u32 %s217_s7, 3  ;;  %1484 = vmatprep.mubr.msk.bf16.mxu0 %vm290_vm1, %v1634_v2  ;;  %v233_v11 = vld [vmem:[%s2098_s4 + $0x18] sm:$0xff]  ;;  %v230_v13 = vld [vmem:[%s2098_s4] sm:$0xff]  ;;  %v1635_v14 = vld [vmem:[%s2095_s1 + $0x8] sm:$0xff]   ;;  %vm453_vm3 = vcmask 408576  }
  0x16   : > { %264 = vperm.xlu1 %1633, %v235_v6   ;;  %s219_s17 = scalar_lea.vmem %s2094_s0, %s1314_s14  ;;  %v306_v9 = vsel %vm304_vm2, %v305_v4, 0  ;;  %v231_v15 = vld [vmem:[%s2098_s4 + $0x8] sm:$0xff]  ;;  %v1636_v16 = vld [vmem:[%s2095_s1 + $0x10] sm:$0xff]   ;;  %v1327_v18 = vld [vmem:[%s2098_s4 + $0x58] sm:$0xff]  ;;  %vm466_vm4 = vcmask 1040384   ;;  %vm1723_vm5 = vmmov 0  }
  0x17   : > { %v228_v8 = vld [vmem:[%s219_s17] sm:$0x1f]  ;;  %v1329_v17 = vld [vmem:[%s2098_s4 + $0x68] sm:$0x3]  ;;  %v1326_v22 = vld [vmem:[%s2098_s4 + $0x50] sm:$0xff]  ;;  %s1658_s22 = scalar_lea.vmem %s2055_s6, 128 }
  0x18   : > { %v229_v10 = vpack.c.bf16 %v228_v8, %v228_v8  ;;  %v1328_v19 = vld [vmem:[%s2098_s4 + $0x60] sm:$0xff]  ;;  %v1637_v20 = vld [vmem:[%s2095_s1 + $0x18] ss:$0 sps:$4 sm:$0x11]   ;;  %v1325_v21 = vld [vmem:[%s2098_s4 + $0x48] sm:$0xff]  ;;  %p1659_p11 = scmp.ne.s32.totalorder %s2055_s6, %s1658_s22  ;;  %s1664_s13 = scalar_lea.vmem %s1663_s12, 256 }
  0x19   : > { %259 = vperm.xlu0 %1632, %v234_v5   ;;  %v1323_v23 = vld [vmem:[%s2098_s4 + $0x38] sm:$0xff]  ;;  %v1324_v24 = vld [vmem:[%s2098_s4 + $0x40] sm:$0xff]  ;;  %v1349_v26 = vld [vmem:[%s2098_s4 + $0x90] sm:$0xff]  ;;  %p1666_p1 = scmp.lt.s32.totalorder %s1664_s13, %s1658_s22 }
  0x1a   : > { %249 = vperm.xlu1 %1633, %v232_v7   ;;  %v308_v12 = vand.u32 %v306_v9, %v229_v10  ;;  %v1351_v25 = vld [vmem:[%s2098_s4 + $0xa0] sm:$0x3]  ;;  %v1350_v27 = vld [vmem:[%s2098_s4 + $0x98] sm:$0xff]  ;;  %v1348_v29 = vld [vmem:[%s2098_s4 + $0x88] sm:$0xff]  ;;  %p1660_p12 = pnand %p1659_p11, %p1793_p5 }
  0x1b   : > { %v1347_v28 = vld [vmem:[%s2098_s4 + $0x80] sm:$0xff]  ;;  %v1345_v30 = vld [vmem:[%s2098_s4 + $0x70] sm:$0xff]  ;;  %v1346_v31 = vld [vmem:[%s2098_s4 + $0x78] sm:$0xff]  ;;  %p1667_p2 = por %p1666_p1, %p1665_p0 }
  0x1c   : > { %1482 = vmatprep.subr.bf16.mxu0 %v308_v12  ;;  %v1373_v32 = vld [vmem:[%s2098_s4 + $0xd8] sm:$0x3]  ;;  %v1371_v33 = vld [vmem:[%s2098_s4 + $0xc8] sm:$0xff]  ;;  %v1372_v34 = vld [vmem:[%s2098_s4 + $0xd0] sm:$0xff]  ;;  %p1661_p13 = pneg %p1660_p12 }
  0x1d   : > { %254 = vperm.xlu0 %1632, %v233_v11   ;;  %1483 = vmatpush3.bf16.msra.mxu0 %v308_v12  ;;  %v1369_v35 = vld [vmem:[%s2098_s4 + $0xb8] sm:$0xff]  ;;  %v1370_v36 = vld [vmem:[%s2098_s4 + $0xc0] sm:$0xff]  ;;  %v1367_v37 = vld [vmem:[%s2098_s4 + $0xa8] sm:$0xff] }
  0x1e   : > { %239 = vperm.xlu1 %1633, %v230_v13   ;;  %v1368_v38 = vld [vmem:[%s2098_s4 + $0xb0] sm:$0xff]  ;;  %v1393_v40 = vld [vmem:[%s2098_s4 + $0x100] sm:$0xff]  ;;  %v1394_v41 = vld [vmem:[%s2098_s4 + $0x108] sm:$0xff]  ;;  %p1668_p3 = pnand %p1667_p2, %p1661_p13 }
  0x1f   : > { %v1395_v39 = vld [vmem:[%s2098_s4 + $0x110] sm:$0x3]  ;;  %v1392_v43 = vld [vmem:[%s2098_s4 + $0xf8] sm:$0xff]  ;;  %v1389_v44 = vld [vmem:[%s2098_s4 + $0xe0] sm:$0xff] }
  0x20   : > { %1485 = vmatmul.mubr.msk.bf16.vlgmr.msra.gmra.mxu0 %vm290_vm1, %v1635_v14  ;;  %v1391_v42 = vld [vmem:[%s2098_s4 + $0xf0] sm:$0xff]  ;;  %v1390_v45 = vld [vmem:[%s2098_s4 + $0xe8] sm:$0xff]  ;;  %v1415_v47 = vld [vmem:[%s2098_s4 + $0x138] sm:$0xff] }
  0x21   : > { %244 = vperm.xlu0 %1632, %v231_v15   ;;  %1488 = vmatprep.mubr.msk.bf16.mxu0 %vm290_vm1, %v1636_v16  ;;  %v1417_v46 = vld [vmem:[%s2098_s4 + $0x148] sm:$0x3]  ;;  %v1416_v48 = vld [vmem:[%s2098_s4 + $0x140] sm:$0xff]  ;;  %v1414_v50 = vld [vmem:[%s2098_s4 + $0x130] sm:$0xff] }
  0x22   : > { %432 = vperm.xlu1 %1633, %v1329_v17   ;;  %v1413_v49 = vld [vmem:[%s2098_s4 + $0x128] sm:$0xff]  ;;  %v1411_v51 = vld [vmem:[%s2098_s4 + $0x118] sm:$0xff]  ;;  %v1412_v52 = vld [vmem:[%s2098_s4 + $0x120] sm:$0xff] }
  0x23   : > { %v1426_v53 = vld [vmem:[%s2098_s4 + $0x150] sm:$0xff]  ;;  %v1638_v54 = vld [vmem:[%s2096_s2] sm:$0xff]  }
  0x24   : > { %1500 = vmatprep.mubr.msk.bf16.mxu1 %vm453_vm3, %v1638_v54 }
  0x25   : > { %422 = vperm.xlu0 %1632, %v1327_v18  }
  0x26   : > { %427 = vperm.xlu1 %1633, %v1328_v19  }
  0x28   : > { %1489 = vmatmul.mubr.msk.bf16.gmra.mxu0 %vm290_vm1, %v1637_v20 }
  0x29   : > { %412 = vperm.xlu0 %1632, %v1325_v21  }
  0x2a   : > { %417 = vperm.xlu1 %1633, %v1326_v22  }
  0x2d   : > { %402 = vperm.xlu0 %1632, %v1323_v23  }
  0x2e   : > { %407 = vperm.xlu1 %1633, %v1324_v24  }
  0x31   : > { %593 = vperm.xlu0 %1632, %v1351_v25   ;;  %v1639_v25 = vld [vmem:[%s2096_s2 + $0x8] sm:$0xff]  }
  0x32   : > { %583 = vperm.xlu1 %1633, %v1349_v26   ;;  %v1640_v26 = vld [vmem:[%s2096_s2 + $0x10] sm:$0xff]  }
  0x35   : > { %588 = vperm.xlu0 %1632, %v1350_v27   ;;  %v1641_v27 = vld [vmem:[%s2096_s2 + $0x18] ss:$0 sps:$4 sm:$0x11]  }
  0x36   : > { %573 = vperm.xlu1 %1633, %v1347_v28   ;;  %v1642_v28 = vld [vmem:[%s2096_s2 + $0x1c] sm:$0xff]  }
  0x37   : > { %1516 = vmatprep.mubr.msk.bf16.mxu0 %vm453_vm3, %v1642_v28 }
  0x39   : > { %578 = vperm.xlu0 %1632, %v1348_v29  }
  0x3a   : > { %563 = vperm.xlu1 %1633, %v1345_v30  }
  0x3d   : > { %568 = vperm.xlu0 %1632, %v1346_v31  }
  0x3e   : > { %752 = vperm.xlu1 %1633, %v1373_v32  }
  0x41   : > { %742 = vperm.xlu0 %1632, %v1371_v33  }
  0x42   : > { %747 = vperm.xlu1 %1633, %v1372_v34  }
  0x45   : > { %732 = vperm.xlu0 %1632, %v1369_v35  }
  0x46   : > { %737 = vperm.xlu1 %1633, %v1370_v36  }
  0x49   : > { %722 = vperm.xlu0 %1632, %v1367_v37  }
  0x4a   : > { %727 = vperm.xlu1 %1633, %v1368_v38  }
  0x4d   : > { %911 = vperm.xlu0 %1632, %v1395_v39  }
  0x4e   : > { %901 = vperm.xlu1 %1633, %v1393_v40  }
  0x51   : > { %906 = vperm.xlu0 %1632, %v1394_v41  }
  0x52   : > { %891 = vperm.xlu1 %1633, %v1391_v42  }
  0x55   : > { %896 = vperm.xlu0 %1632, %v1392_v43  }
  0x56   : > { %881 = vperm.xlu1 %1633, %v1389_v44  }
  0x59   : > { %886 = vperm.xlu0 %1632, %v1390_v45  }
  0x5a   : > { %1070 = vperm.xlu1 %1633, %v1417_v46  }
  0x5d   : > { %1060 = vperm.xlu0 %1632, %v1415_v47  }
  0x5e   : > { %1065 = vperm.xlu1 %1633, %v1416_v48  }
  0x61   : > { %1050 = vperm.xlu0 %1632, %v1413_v49  }
  0x62   : > { %1055 = vperm.xlu1 %1633, %v1414_v50  }
  0x65   : > { %1040 = vperm.xlu0 %1632, %v1411_v51  }
  0x66   : > { %1045 = vperm.xlu1 %1633, %v1412_v52  }
  0x69   : > { %1186 = vperm.xlu0 %1632, %v1426_v53  }
  0x90   : > { %v270_v55 = vpop.permute.xlu0 %269 }
  0x91   : > { %v265_v60 = vpop.permute.xlu1 %264 }
  0x94   : > { %v260_v58 = vpop.permute.xlu0 %259 }
  0x95   : > { %v250_v3 = vpop.permute.xlu1 %249 }
  0x98   : > { %v255_v0 = vpop.permute.xlu0 %254 }
  0x99   : > { %v240_v17 = vpop.permute.xlu1 %239 }
  0x9c   : > { %v245_v12 = vpop.permute.xlu0 %244 }
  0x9d   : > { %v433_v29 = vpop.permute.xlu1 %432 }
  0xa0   : > { %v423_v34 = vpop.permute.xlu0 %422 }
  0xa1   : > { %v428_v32 = vpop.permute.xlu1 %427 }
  0xa4   : > { %v413_v41 = vpop.permute.xlu0 %412 }
  0xa5   : > { %v418_v38 = vpop.permute.xlu1 %417 }
  0xa9   : > { %v408_v50 = vpop.permute.xlu1 %407 }
  0xe0   : > { %v1486_v56 = vpop.f32.mrf.mxu0 }
  0xe1   : > { %v353_v9 = vadd.f32 %v1486_v56, %v250_v3 }
  0xe2   : > { %v344_v57 = vpop.f32.mrf.mxu0 }
  0xe3   : > { %v376_v18 = vmax.f32 %v353_v9, 0.0  ;;  %v345_v19 = vadd.f32 %v344_v57, %v240_v17 }
  0xe4   : > { %v1487_v59 = vpop.f32.mrf.mxu0 }
  0xe5   : > { %v356_v5 = vadd.f32 %v1487_v59, %v255_v0  ;;  %v374_v23 = vmax.f32 %v345_v19, 0.0  ;;  %v1644_v0 = vld [vmem:[%s2096_s2 + $0x2c] sm:$0xff]  }
  0xe6   : > { %v347_v61 = vpop.f32.mrf.mxu0 }
  0xe7   : > { %v377_v13 = vmax.f32 %v356_v5, 0.0  ;;  %v348_v14 = vadd.f32 %v347_v61, %v245_v12 }
  0xe8   : > { %v1490_v62 = vpop.f32.mrf.mxu0 }
  0xe9   : > { %v369_v63 = vadd.f32 %v1490_v62, %v270_v55  ;;  %v389_v21 = vpack.c.bf16 %v377_v13, %v376_v18  ;;  %v375_v22 = vmax.f32 %v348_v14, 0.0  ;;  %v403_v55 = vpop.permute.xlu0 %402 }
  0xea   : > { %v360_v1 = vpop.f32.mrf.mxu0 }
  0xeb   : > { %v380_v2 = vmax.f32 %v369_v63, 0.0  ;;  %v361_v6 = vadd.f32 %v360_v1, %v260_v58  ;;  %v388_v24 = vpack.c.bf16 %v375_v22, %v374_v23  ;;  %v1643_v63 = vld [vmem:[%s2096_s2 + $0x24] sm:$0xff]   ;;  %v1645_v1 = vld [vmem:[%s2096_s2 + $0x34] ss:$0 sps:$4 sm:$0x11]  }
  0xec   : > { %v1491_v4 = vpop.f32.mrf.mxu0 }
  0xed   : > { %v391_v7 = vpack.c.bf16 %v380_v2, %v380_v2  ;;  %v378_v15 = vmax.f32 %v361_v6, 0.0  ;;  %v1646_v2 = vld [vmem:[%s2096_s2 + $0x38] sm:$0xff]   ;;  %v594_v3 = vpop.permute.xlu0 %593 }
  0xee   : > { %v363_v8 = vpop.f32.mrf.mxu0 }
  0xef   : > { %v364_v10 = vadd.f32 %v363_v8, %v265_v60  ;;  %1584 = vmatprep.subr.msk.bf16.mxu1 %vm466_vm4, %v391_v7  ;;  %v468_v11 = vsel %vm466_vm4, %v391_v7, 0  ;;  %v584_v8 = vpop.permute.xlu1 %583 }
  0xf0   : > { %1493 = vmatpush3.bf16.msra.mxu1 %v468_v11 }
  0xf1   : > { %v379_v16 = vmax.f32 %v364_v10, 0.0  ;;  %v589_v6 = vpop.permute.xlu0 %588 }
  0xf3   : > { %v390_v20 = vpack.c.bf16 %v379_v16, %v378_v15  ;;  %v574_v15 = vpop.permute.xlu1 %573 }
  0xf5   : > { %1494 = vmatprep.subr.bf16.mxu1 %v390_v20  ;;  %v579_v12 = vpop.permute.xlu0 %578 }
  0xf6   : > { %1495 = vmatpush3.bf16.msra.mxu1 %v390_v20 }
  0xf7   : > { %1496 = vmatprep.subr.bf16.mxu1 %v389_v21 }
  0xfa   : > { %1497 = vmatpush3.bf16.msra.mxu1 %v389_v21 }
  0xfb   : > { %1498 = vmatprep.subr.bf16.mxu1 %v388_v24 }
  0xfe   : > { %1499 = vmatpush3.bf16.msra.mxu1 %v388_v24  ;;  %v569_v24 = vpop.permute.xlu0 %568 }
 0x101   : > { %1501 = vmatmul.mubr.msk.bf16.vlgmr.msra.gmra.mxu1 %vm453_vm3, %v1639_v25 }
 0x102   : > { %1504 = vmatprep.mubr.msk.bf16.mxu1 %vm453_vm3, %v1640_v26 }
 0x109   : > { %1505 = vmatmul.mubr.msk.bf16.gmra.mxu1 %vm453_vm3, %v1641_v27 }
 0x10a   : > { %1532 = vmatprep.mubr.msk.bf16.mxu1 %vm453_vm3, %v1646_v2 }
 0x1c1   : > { %v1502_v30 = vpop.f32.mrf.mxu1 }
 0x1c2   : > { %v513_v47 = vadd.f32 %v1502_v30, %v413_v41 }
 0x1c3   : > { %v504_v31 = vpop.f32.mrf.mxu1 }
 0x1c4   : > { %v536_v56 = vmax.f32 %v513_v47, 0.0  ;;  %v505_v57 = vadd.f32 %v504_v31, %v403_v55 }
 0x1c5   : > { %v1503_v33 = vpop.f32.mrf.mxu1 }
 0x1c6   : > { %v516_v43 = vadd.f32 %v1503_v33, %v418_v38  ;;  %v534_v61 = vmax.f32 %v505_v57, 0.0  ;;  %v1648_v38 = vld [vmem:[%s2096_s2 + $0x48] sm:$0xff]  }
 0x1c7   : > { %v507_v35 = vpop.f32.mrf.mxu1 }
 0x1c8   : > { %v537_v51 = vmax.f32 %v516_v43, 0.0  ;;  %v508_v52 = vadd.f32 %v507_v35, %v408_v50 }
 0x1c9   : > { %v1506_v36 = vpop.f32.mrf.mxu1 }
 0x1ca   : > { %v529_v37 = vadd.f32 %v1506_v36, %v433_v29  ;;  %v550_v59 = vpack.c.bf16 %v537_v51, %v536_v56  ;;  %v535_v60 = vmax.f32 %v508_v52, 0.0  ;;  %v564_v29 = vpop.permute.xlu1 %563 }
 0x1cb   : > { %v520_v39 = vpop.f32.mrf.mxu1 }
 0x1cc   : > { %v540_v40 = vmax.f32 %v529_v37, 0.0  ;;  %v521_v45 = vadd.f32 %v520_v39, %v423_v34  ;;  %v549_v62 = vpack.c.bf16 %v535_v60, %v534_v61  ;;  %v1647_v37 = vld [vmem:[%s2096_s2 + $0x40] sm:$0xff]   ;;  %v1649_v39 = vld [vmem:[%s2096_s2 + $0x50] ss:$0 sps:$4 sm:$0x11]  }
 0x1cd   : > { %v1507_v42 = vpop.f32.mrf.mxu1 }
 0x1ce   : > { %v552_v44 = vpack.c.bf16 %v540_v40, %v540_v40  ;;  %v538_v53 = vmax.f32 %v521_v45, 0.0  ;;  %v1650_v40 = vld [vmem:[%s2096_s2 + $0x54] sm:$0xff]   ;;  %v753_v41 = vpop.permute.xlu1 %752 }
 0x1cf   : > { %v523_v46 = vpop.f32.mrf.mxu1 }
 0x1d0   : > { %v524_v48 = vadd.f32 %v523_v46, %v428_v32  ;;  %1585 = vmatprep.subr.msk.bf16.mxu0 %vm466_vm4, %v552_v44  ;;  %v627_v49 = vsel %vm466_vm4, %v552_v44, 0  ;;  %v743_v46 = vpop.permute.xlu0 %742 }
 0x1d1   : > { %1509 = vmatpush3.bf16.msra.mxu0 %v627_v49 }
 0x1d2   : > { %v539_v54 = vmax.f32 %v524_v48, 0.0  ;;  %v748_v44 = vpop.permute.xlu1 %747 }
 0x1d4   : > { %v551_v58 = vpack.c.bf16 %v539_v54, %v538_v53  ;;  %v733_v53 = vpop.permute.xlu0 %732 }
 0x1d6   : > { %1510 = vmatprep.subr.bf16.mxu0 %v551_v58  ;;  %v738_v50 = vpop.permute.xlu1 %737 }
 0x1d7   : > { %1511 = vmatpush3.bf16.msra.mxu0 %v551_v58 }
 0x1d8   : > { %1512 = vmatprep.subr.bf16.mxu0 %v550_v59 }
 0x1db   : > { %1513 = vmatpush3.bf16.msra.mxu0 %v550_v59 }
 0x1dc   : > { %1514 = vmatprep.subr.bf16.mxu0 %v549_v62 }
 0x1df   : > { %1515 = vmatpush3.bf16.msra.mxu0 %v549_v62  ;;  %v728_v62 = vpop.permute.xlu1 %727 }
 0x1e2   : > { %1517 = vmatmul.mubr.msk.bf16.vlgmr.msra.gmra.mxu0 %vm453_vm3, %v1643_v63 }
 0x1e3   : > { %1520 = vmatprep.mubr.msk.bf16.mxu0 %vm453_vm3, %v1644_v0 }
 0x1ea   : > { %1521 = vmatmul.mubr.msk.bf16.gmra.mxu0 %vm453_vm3, %v1645_v1 }
 0x1eb   : > { %1548 = vmatprep.mubr.msk.bf16.mxu0 %vm453_vm3, %v1650_v40 }
 0x2a2   : > { %v1518_v4 = vpop.f32.mrf.mxu0 }
 0x2a3   : > { %v672_v21 = vadd.f32 %v1518_v4, %v574_v15 }
 0x2a4   : > { %v663_v5 = vpop.f32.mrf.mxu0 }
 0x2a5   : > { %v695_v30 = vmax.f32 %v672_v21, 0.0  ;;  %v664_v31 = vadd.f32 %v663_v5, %v564_v29 }
 0x2a6   : > { %v1519_v7 = vpop.f32.mrf.mxu0 }
 0x2a7   : > { %v675_v17 = vadd.f32 %v1519_v7, %v579_v12  ;;  %v693_v35 = vmax.f32 %v664_v31, 0.0  ;;  %v1652_v12 = vld [vmem:[%s2096_s2 + $0x64] sm:$0xff]  }
 0x2a8   : > { %v666_v9 = vpop.f32.mrf.mxu0 }
 0x2a9   : > { %v696_v25 = vmax.f32 %v675_v17, 0.0  ;;  %v667_v26 = vadd.f32 %v666_v9, %v569_v24 }
 0x2aa   : > { %v1522_v10 = vpop.f32.mrf.mxu0 }
 0x2ab   : > { %v688_v11 = vadd.f32 %v1522_v10, %v594_v3  ;;  %v709_v33 = vpack.c.bf16 %v696_v25, %v695_v30  ;;  %v694_v34 = vmax.f32 %v667_v26, 0.0  ;;  %v723_v3 = vpop.permute.xlu0 %722 }
 0x2ac   : > { %v679_v13 = vpop.f32.mrf.mxu0 }
 0x2ad   : > { %v699_v14 = vmax.f32 %v688_v11, 0.0  ;;  %v680_v19 = vadd.f32 %v679_v13, %v584_v8  ;;  %v708_v36 = vpack.c.bf16 %v694_v34, %v693_v35  ;;  %v1651_v11 = vld [vmem:[%s2096_s2 + $0x5c] sm:$0xff]   ;;  %v1653_v13 = vld [vmem:[%s2096_s2 + $0x6c] ss:$0 sps:$4 sm:$0x11]  }
 0x2ae   : > { %v1523_v16 = vpop.f32.mrf.mxu0 }
 0x2af   : > { %v711_v18 = vpack.c.bf16 %v699_v14, %v699_v14  ;;  %v697_v27 = vmax.f32 %v680_v19, 0.0  ;;  %v1654_v14 = vld [vmem:[%s2096_s2 + $0x70] sm:$0xff]   ;;  %v912_v15 = vpop.permute.xlu0 %911 }
 0x2b0   : > { %v682_v20 = vpop.f32.mrf.mxu0 }
 0x2b1   : > { %v683_v22 = vadd.f32 %v682_v20, %v589_v6  ;;  %1586 = vmatprep.subr.msk.bf16.mxu1 %vm466_vm4, %v711_v18  ;;  %v786_v23 = vsel %vm466_vm4, %v711_v18, 0  ;;  %v902_v20 = vpop.permute.xlu1 %901 }
 0x2b2   : > { %1525 = vmatpush3.bf16.msra.mxu1 %v786_v23 }
 0x2b3   : > { %v698_v28 = vmax.f32 %v683_v22, 0.0  ;;  %v907_v18 = vpop.permute.xlu0 %906 }
 0x2b5   : > { %v710_v32 = vpack.c.bf16 %v698_v28, %v697_v27  ;;  %v892_v27 = vpop.permute.xlu1 %891 }
 0x2b7   : > { %1526 = vmatprep.subr.bf16.mxu1 %v710_v32  ;;  %v897_v24 = vpop.permute.xlu0 %896 }
 0x2b8   : > { %1527 = vmatpush3.bf16.msra.mxu1 %v710_v32 }
 0x2b9   : > { %1528 = vmatprep.subr.bf16.mxu1 %v709_v33 }
 0x2bc   : > { %1529 = vmatpush3.bf16.msra.mxu1 %v709_v33 }
 0x2bd   : > { %1530 = vmatprep.subr.bf16.mxu1 %v708_v36 }
 0x2c0   : > { %1531 = vmatpush3.bf16.msra.mxu1 %v708_v36  ;;  %v887_v36 = vpop.permute.xlu0 %886 }
 0x2c3   : > { %1533 = vmatmul.mubr.msk.bf16.vlgmr.msra.gmra.mxu1 %vm453_vm3, %v1647_v37 }
 0x2c4   : > { %1536 = vmatprep.mubr.msk.bf16.mxu1 %vm453_vm3, %v1648_v38 }
 0x2cb   : > { %1537 = vmatmul.mubr.msk.bf16.gmra.mxu1 %vm453_vm3, %v1649_v39 }
 0x2cc   : > { %1564 = vmatprep.mubr.msk.bf16.mxu1 %vm453_vm3, %v1654_v14 }
 0x383   : > { %v1534_v42 = vpop.f32.mrf.mxu1 }
 0x384   : > { %v831_v59 = vadd.f32 %v1534_v42, %v733_v53 }
 0x385   : > { %v822_v43 = vpop.f32.mrf.mxu1 }
 0x386   : > { %v854_v4 = vmax.f32 %v831_v59, 0.0  ;;  %v823_v5 = vadd.f32 %v822_v43, %v723_v3  ;;  %v1061_v59 = vpop.permute.xlu0 %1060 }
 0x387   : > { %v1535_v45 = vpop.f32.mrf.mxu1 }
 0x388   : > { %v834_v55 = vadd.f32 %v1535_v45, %v738_v50  ;;  %v852_v9 = vmax.f32 %v823_v5, 0.0  ;;  %v1656_v50 = vld [vmem:[%s2096_s2 + $0x80] sm:$0xff]  }
 0x389   : > { %v825_v47 = vpop.f32.mrf.mxu1 }
 0x38a   : > { %v855_v63 = vmax.f32 %v834_v55, 0.0  ;;  %v826_v0 = vadd.f32 %v825_v47, %v728_v62 }
 0x38b   : > { %v1538_v48 = vpop.f32.mrf.mxu1 }
 0x38c   : > { %v847_v49 = vadd.f32 %v1538_v48, %v753_v41  ;;  %v868_v7 = vpack.c.bf16 %v855_v63, %v854_v4  ;;  %v853_v8 = vmax.f32 %v826_v0, 0.0  ;;  %v882_v41 = vpop.permute.xlu1 %881  ;;  %v1051_v4 = vpop.permute.xlu0 %1050 }
 0x38d   : > { %v838_v51 = vpop.f32.mrf.mxu1 }
 0x38e   : > { %v858_v52 = vmax.f32 %v847_v49, 0.0  ;;  %v839_v57 = vadd.f32 %v838_v51, %v743_v46  ;;  %v867_v10 = vpack.c.bf16 %v853_v8, %v852_v9  ;;  %v1655_v49 = vld [vmem:[%s2096_s2 + $0x78] sm:$0xff]   ;;  %v1657_v51 = vld [vmem:[%s2096_s2 + $0x88] ss:$0 sps:$4 sm:$0x11]  }
 0x38f   : > { %v1539_v54 = vpop.f32.mrf.mxu1 }
 0x390   : > { %v870_v56 = vpack.c.bf16 %v858_v52, %v858_v52  ;;  %v856_v1 = vmax.f32 %v839_v57, 0.0  ;;  %v1722_v52 = vmov 0.0   ;;  %v1071_v53 = vpop.permute.xlu1 %1070 }
 0x391   : > { %v841_v58 = vpop.f32.mrf.mxu1 }
 0x392   : > { %v842_v60 = vadd.f32 %v841_v58, %v748_v44  ;;  %1587 = vmatprep.subr.msk.bf16.mxu0 %vm466_vm4, %v870_v56  ;;  %v945_v61 = vsel %vm466_vm4, %v870_v56, 0 }
 0x393   : > { %1541 = vmatpush3.bf16.msra.mxu0 %v945_v61 }
 0x394   : > { %v857_v2 = vmax.f32 %v842_v60, 0.0  ;;  %v1066_v57 = vpop.permute.xlu1 %1065 }
 0x396   : > { %v869_v6 = vpack.c.bf16 %v857_v2, %v856_v1 }
 0x398   : > { %1542 = vmatprep.subr.bf16.mxu0 %v869_v6  ;;  %v1056_v0 = vpop.permute.xlu1 %1055 }
 0x399   : > { %1543 = vmatpush3.bf16.msra.mxu0 %v869_v6 }
 0x39a   : > { %1544 = vmatprep.subr.bf16.mxu0 %v868_v7 }
 0x39d   : > { %1545 = vmatpush3.bf16.msra.mxu0 %v868_v7 }
 0x39e   : > { %1546 = vmatprep.subr.bf16.mxu0 %v867_v10 }
 0x3a1   : > { %1547 = vmatpush3.bf16.msra.mxu0 %v867_v10 }
 0x3a2   : > { %1572 = vmatprep.subr.bf16.mxu0 %v1722_v52 }
 0x3a4   : > { %1549 = vmatmul.mubr.msk.bf16.vlgmr.msra.gmra.mxu0 %vm453_vm3, %v1651_v11 }
 0x3a5   : > { %1552 = vmatprep.mubr.msk.bf16.mxu0 %vm453_vm3, %v1652_v12  ;;  %v1046_v12 = vpop.permute.xlu1 %1045 }
 0x3ac   : > { %1553 = vmatmul.mubr.msk.bf16.gmra.mxu0 %vm453_vm3, %v1653_v13 }
 0x3ad   : > { %1580 = vmatprep.mubr.msk.bf16.mxu0 %vm1723_vm5, %v1722_v52 }
 0x464   : > { %v1550_v16 = vpop.f32.mrf.mxu0 }
 0x465   : > { %v990_v33 = vadd.f32 %v1550_v16, %v892_v27  ;;  %v1041_v16 = vpop.permute.xlu0 %1040 }
 0x466   : > { %v981_v17 = vpop.f32.mrf.mxu0 }
 0x467   : > { %v1013_v42 = vmax.f32 %v990_v33, 0.0  ;;  %v982_v43 = vadd.f32 %v981_v17, %v882_v41 }
 0x468   : > { %v1551_v19 = vpop.f32.mrf.mxu0 }
 0x469   : > { %v993_v29 = vadd.f32 %v1551_v19, %v897_v24  ;;  %v1011_v47 = vmax.f32 %v982_v43, 0.0  ;;  %v1187_v24 = vpop.permute.xlu0 %1186 }
 0x46a   : > { %v984_v21 = vpop.f32.mrf.mxu0 }
 0x46b   : > { %v1014_v37 = vmax.f32 %v993_v29, 0.0  ;;  %v985_v38 = vadd.f32 %v984_v21, %v887_v36 }
 0x46c   : > { %v1554_v22 = vpop.f32.mrf.mxu0 }
 0x46d   : > { %v1006_v23 = vadd.f32 %v1554_v22, %v912_v15  ;;  %v1027_v45 = vpack.c.bf16 %v1014_v37, %v1013_v42  ;;  %v1012_v46 = vmax.f32 %v985_v38, 0.0 }
 0x46e   : > { %v997_v25 = vpop.f32.mrf.mxu0 }
 0x46f   : > { %v1017_v26 = vmax.f32 %v1006_v23, 0.0  ;;  %v998_v31 = vadd.f32 %v997_v25, %v902_v20  ;;  %v1026_v48 = vpack.c.bf16 %v1012_v46, %v1011_v47  ;;  %v1177_v23 = vld [vmem:[%s2097_s3] sm:$0x7] }
 0x470   : > { %v1555_v28 = vpop.f32.mrf.mxu0 }
 0x471   : > { %v1029_v30 = vpack.c.bf16 %v1017_v26, %v1017_v26  ;;  %v1015_v39 = vmax.f32 %v998_v31, 0.0 }
 0x472   : > { %v1000_v32 = vpop.f32.mrf.mxu0 }
 0x473   : > { %v1001_v34 = vadd.f32 %v1000_v32, %v907_v18  ;;  %1588 = vmatprep.subr.msk.bf16.mxu1 %vm466_vm4, %v1029_v30  ;;  %v1104_v35 = vsel %vm466_vm4, %v1029_v30, 0 }
 0x474   : > { %1557 = vmatpush3.bf16.msra.mxu1 %v1104_v35 }
 0x475   : > { %v1016_v40 = vmax.f32 %v1001_v34, 0.0 }
 0x477   : > { %v1028_v44 = vpack.c.bf16 %v1016_v40, %v1015_v39 }
 0x479   : > { %1558 = vmatprep.subr.bf16.mxu1 %v1028_v44 }
 0x47a   : > { %1559 = vmatpush3.bf16.msra.mxu1 %v1028_v44 }
 0x47b   : > { %1560 = vmatprep.subr.bf16.mxu1 %v1027_v45 }
 0x47e   : > { %1561 = vmatpush3.bf16.msra.mxu1 %v1027_v45 }
 0x47f   : > { %1562 = vmatprep.subr.bf16.mxu1 %v1026_v48 }
 0x482   : > { %1563 = vmatpush3.bf16.msra.mxu1 %v1026_v48 }
 0x485   : > { %1565 = vmatmul.mubr.msk.bf16.vlgmr.msra.gmra.mxu1 %vm453_vm3, %v1655_v49 }
 0x486   : > { %1568 = vmatprep.mubr.msk.bf16.mxu1 %vm453_vm3, %v1656_v50 }
 0x48d   : > { %1569 = vmatmul.mubr.msk.bf16.gmra.mxu1 %vm453_vm3, %v1657_v51 }
 0x545   : > { %v1566_v54 = vpop.f32.mrf.mxu1 }
 0x546   : > { %v1149_v9 = vadd.f32 %v1566_v54, %v1051_v4 }
 0x547   : > { %v1140_v55 = vpop.f32.mrf.mxu1 }
 0x548   : > { %v1172_v17 = vmax.f32 %v1149_v9, 0.0  ;;  %v1141_v18 = vadd.f32 %v1140_v55, %v1041_v16 }
 0x549   : > { %v1567_v56 = vpop.f32.mrf.mxu1 }
 0x54a   : > { %v1152_v6 = vadd.f32 %v1567_v56, %v1056_v0  ;;  %v1170_v21 = vmax.f32 %v1141_v18, 0.0 }
 0x54b   : > { %v1143_v58 = vpop.f32.mrf.mxu1 }
 0x54c   : > { %v1173_v13 = vmax.f32 %v1152_v6, 0.0  ;;  %v1144_v14 = vadd.f32 %v1143_v58, %v1046_v12 }
 0x54d   : > { %v1570_v60 = vpop.f32.mrf.mxu1 }
 0x54e   : > { %v1165_v61 = vadd.f32 %v1570_v60, %v1071_v53  ;;  %v1179_v19 = vpack.c.bf16 %v1173_v13, %v1172_v17  ;;  %v1171_v20 = vmax.f32 %v1144_v14, 0.0 }
 0x54f   : > { %v1156_v62 = vpop.f32.mrf.mxu1 }
 0x550   : > { %v1176_v63 = vmax.f32 %v1165_v61, 0.0  ;;  %v1157_v3 = vadd.f32 %v1156_v62, %v1061_v59  ;;  %v1178_v22 = vpack.c.bf16 %v1171_v20, %v1170_v21 }
 0x551   : > { %v1571_v1 = vpop.f32.mrf.mxu1 }
 0x552   : > { %v1181_v2 = vpack.c.bf16 %v1176_v63, %v1176_v63  ;;  %v1174_v10 = vmax.f32 %v1157_v3, 0.0 }
 0x553   : > { %v1159_v5 = vpop.f32.mrf.mxu1 }
 0x554   : > { %v1160_v7 = vadd.f32 %v1159_v5, %v1066_v57  ;;  %v1193_v8 = vsel %vm466_vm4, %v1181_v2, 0 }
 0x555   : > { %1573 = vmatpush3.bf16.msra.mxu0 %v1193_v8 }
 0x556   : > { %v1175_v11 = vmax.f32 %v1160_v7, 0.0  ;;  %1574 = vmatprep.subr.bf16.mxu0 %v1722_v52 }
 0x558   : > { %v1180_v15 = vpack.c.bf16 %v1175_v11, %v1174_v10 }
 0x55a   : > { %1575 = vmatpush3.bf16.msra.mxu0 %v1180_v15 }
 0x55b   : > { %1576 = vmatprep.subr.bf16.mxu0 %v1722_v52 }
 0x55e   : > { %1577 = vmatpush3.bf16.msra.mxu0 %v1179_v19 }
 0x55f   : > { %1578 = vmatprep.subr.bf16.mxu0 %v1722_v52 }
 0x562   : > { %1579 = vmatpush3.bf16.msra.mxu0 %v1178_v22 }
 0x565   : > { %1581 = vmatmul.mubr.msk.bf16.vlgmr.msra.gmra.mxu0 %vm453_vm3, %v1177_v23 }
 0x625   : > { %v1229_v25 = vpop.f32.mrf.mxu0 }
 0x626   : > { %v1230_v26 = vadd.f32 %v1229_v25, %v1187_v24 }
 0x627   : > { %v1582_v27 = vpop.f32.mrf.mxu0 }
 0x628   : > { %1235 = vst [vmem:[%s215_s30] sm:$0x1f] %v1230_v26 }
 0x629   : > { %v1232_v28 = vpop.f32.mrf.mxu0 }
 0x62a   : > { %1671 = shalt.err (!%p1668_p3)
}
 0x62b   : > { %s1672_s14 = scalar_lea.hbm %s2053_s9, 128  ;;  %s1676_s17 = scalar_lea.hbm %s2099_s5, 256 }
 0x62c   : > { %p1673_p4 = scmp.ne.s32.totalorder %s2053_s9, %s1672_s14  ;;  %p1677_p9 = scmp.lt.s32.totalorder %s2053_s9, %s2099_s5 }
 0x62d   : > { %p1678_p10 = scmp.lt.s32.totalorder %s1676_s17, %s1672_s14 }
 0x62e   : > { %p1674_p7 = pnand %p1673_p4, %p1793_p5 }
 0x62f   : > { %p1679_p11 = por %p1678_p10, %p1677_p9 }
 0x630   : > { %p1675_p8 = pneg %p1674_p7 }
 0x632   : > { %p1680_p12 = pnand %p1679_p11, %p1675_p8 }
 0x634   : > { %1683 = shalt.err (!%p1680_p12)
}
 0x635   : > { %1589 = dma.vmem_to_hbm [thread:$0]  (%p1793_p5), %s2055_s6, 128, %s2053_s9, %s1237_s10   ;;  %v1583_v29 = vpop.f32.mrf.mxu0 }
 0x636 PF: > { %p1595_p13 = scmp.ge.s32.totalorder %s1718_s21, 2  ;;  %s1262_s26 = sand.u32 1, %s1706_s18  }
 0x637   : > { %s1263_s30 = scalar_lea.sflag [#allocation3], %s1262_s26 }
 0x638   : > { %p1592_p0 = pnand %p1595_p13, %p1797_p6 }
 0x63a   : > { %p1593_p1 = pneg %p1592_p0 }
 0x63c   : > { %1701 = dma.done.wait (%p1593_p1), %s1263_s30, 128  }
 0x63d   : > { %1703 = vsyncadd (%p1593_p1), %s1263_s30, 4294967168  ;;  %p15_p2 = scmp.ge.s32.totalorder %s1780_s24, 4   ;;  %s2102_s18 = smov %s1710_s19 }
 0x63e   : > { %s2103_s19 = smov %s1714_s20  ;;  %s2104_s20 = smov %s1791_s27 }
 0x63f   : > { %s2105_s21 = smov %s1780_s24  ;;  %17 = sbr.rel (!%p15_p2) target bundleno = 3 (0x3), region = 85 }
 0x644   :  { %1268 = vsyncpa [#allocation3], 1 }
 0x645   :  { %1270 = vsyncpa [#allocation3 + $0x1], 1 }

</bundles_post_ra>
